<compile_context>
chip_gen: v7x
topology: tpu7x:2x2x1
jax: 0.10.0
libtpu: 0.0.40
codegen_flags: <defaults>
</compile_context>

<pallas_src>
import math

import jax
import jax.numpy as jnp
from jax.experimental import pallas as pl
from jax.experimental.pallas import tpu as pltpu


def ae_forward_kernel(x_ref,
                      w1_ref, b1_ref,
                      w2_ref, b2_ref,
                      w3_ref, b3_ref,
                      w4_ref, b4_ref,
                      out_ref):
    """Whole AE forward chain for one batch tile (weights resident in VMEM)."""
    # bf16 operands into the MXU, f32 accumulation throughout.
    x = x_ref[...].astype(jnp.bfloat16)

    # Encoder: Linear + ReLU (build_mlp places a ReLU after every Linear,
    # including the final z projection).
    h = jnp.dot(x, w1_ref[...], preferred_element_type=jnp.float32) + b1_ref[...]
    h = jnp.maximum(h, 0.0).astype(jnp.bfloat16)

    h = jnp.dot(h, w2_ref[...], preferred_element_type=jnp.float32) + b2_ref[...]
    h = jnp.maximum(h, 0.0).astype(jnp.bfloat16)

    z = jnp.dot(h, w3_ref[...], preferred_element_type=jnp.float32) + b3_ref[...]
    z = jnp.maximum(z, 0.0).astype(jnp.bfloat16)

    # Decoder: hidden MLP is empty (decode_dim == []); just the reconstruction
    # Linear, no output activation.
    recon = jnp.dot(z, w4_ref[...], preferred_element_type=jnp.float32) + b4_ref[...]
    out_ref[...] = recon.astype(out_ref.dtype)


def _round_up(n, m):
    return ((n + m - 1) // m) * m


def prepare_params(params, *, z_pad_to=128, compute_dtype=jnp.bfloat16):
    """Pad the z bottleneck to a lane-aligned width and cast weights to bf16.

    Zero-padding w3 columns / b3 / w4 rows is numerically exact:
    relu(x @ 0 + 0) = 0 and the corresponding w4 rows are zero.
    """
    zd = params["w3"].shape[1]
    zd_pad = _round_up(zd, z_pad_to)

    w3 = params["w3"]
    b3 = params["b3"]
    w4 = params["w4"]
    if zd_pad != zd:
        w3 = jnp.pad(w3, ((0, 0), (0, zd_pad - zd)))
        b3 = jnp.pad(b3, ((0, 0), (0, zd_pad - zd)))
        w4 = jnp.pad(w4, ((0, zd_pad - zd), (0, 0)))

    out = {
        "w1": params["w1"].astype(compute_dtype),
        "w2": params["w2"].astype(compute_dtype),
        "w3": w3.astype(compute_dtype),
        "w4": w4.astype(compute_dtype),
        # Biases stay f32: they are added to the f32 accumulator.
        "b1": params["b1"].astype(jnp.float32),
        "b2": params["b2"].astype(jnp.float32),
        "b3": b3.astype(jnp.float32),
        "b4": params["b4"].astype(jnp.float32),
    }
    return out


def ae_forward(x, prepared, *, bm=256):
    """AE forward.  `prepared` must come from prepare_params()."""
    B, x_dim = x.shape
    h1 = prepared["w1"].shape[1]
    h2 = prepared["w2"].shape[1]
    zd = prepared["w3"].shape[1]
    assert prepared["w4"].shape == (zd, x_dim)

    # Batch tile: large enough to fill the MXU, but never (pointlessly) larger
    # than the padded batch.  Keep a multiple of 8 (sublane).
    bm = min(bm, _round_up(B, 8))
    grid = (pl.cdiv(B, bm),)

    def full(shape):
        # Whole-array block (weights / biases, same block at every grid step).
        return pl.BlockSpec(shape, lambda i: (0, 0))

    def nbytes(shape, dtype):
        return math.prod(shape) * jnp.dtype(dtype).itemsize

    # Rough scoped-VMEM budget: double-buffered x/out tiles + weights/biases
    # (conservatively also counted double-buffered), with 2x headroom.
    est = 2 * (nbytes((bm, x_dim), x.dtype) + nbytes((bm, x_dim), x.dtype))
    est += 2 * sum(nbytes(prepared[k].shape, prepared[k].dtype) for k in prepared)
    vmem_limit = int(min(64 * 2**20, max(32 * 2**20, 2 * est)))

    return pl.pallas_call(
        ae_forward_kernel,
        out_shape=jax.ShapeDtypeStruct((B, x_dim), x.dtype),
        grid_spec=pltpu.PrefetchScalarGridSpec(
            num_scalar_prefetch=0,
            grid=grid,
            in_specs=[
                pl.BlockSpec((bm, x_dim), lambda i: (i, 0)),   # x tile
                full((x_dim, h1)), full((1, h1)),              # encoder layer 1
                full((h1, h2)),    full((1, h2)),              # encoder layer 2
                full((h2, zd)),    full((1, zd)),              # encoder layer 3 (z)
                full((zd, x_dim)), full((1, x_dim)),           # decoder reconstruction
            ],
            out_specs=pl.BlockSpec((bm, x_dim), lambda i: (i, 0)),
        ),
        compiler_params=pltpu.CompilerParams(
            dimension_semantics=("parallel",),
            vmem_limit_bytes=vmem_limit),
    )(x,
      prepared["w1"], prepared["b1"],
      prepared["w2"], prepared["b2"],
      prepared["w3"], prepared["b3"],
      prepared["w4"], prepared["b4"])


def init_params(key, x_dim, encode_dim, z_dim, dtype=jnp.float32):
    """Xavier-normal weights (matching init.xavier_normal_), zero biases."""
    dims = [x_dim] + list(encode_dim) + [z_dim]                       # encoder
    layer_shapes = list(zip(dims[:-1], dims[1:])) + [(z_dim, x_dim)]  # + decoder
    params = {}
    keys = jax.random.split(key, len(layer_shapes))
    for idx, ((fan_in, fan_out), k) in enumerate(zip(layer_shapes, keys), start=1):
        std = (2.0 / (fan_in + fan_out)) ** 0.5
        params[f"w{idx}"] = (std * jax.random.normal(k, (fan_in, fan_out))).astype(dtype)
        params[f"b{idx}"] = jnp.zeros((1, fan_out), dtype=dtype)
    return params


def ae_forward_ref(x, p):
    """Pure-JAX f32 reference (matches the PyTorch module's math)."""
    h = jax.nn.relu(x @ p["w1"] + p["b1"])
    h = jax.nn.relu(h @ p["w2"] + p["b2"])
    z = jax.nn.relu(h @ p["w3"] + p["b3"])
    return z @ p["w4"] + p["b4"]


if __name__ == "__main__":
    # Shapes consistent with dims = [x_dim, z_dim, encode_dim=[h1,h2], decode_dim=[]].
    # B=512 with bm=256 gives a 2-step "parallel" grid (uses both TCs on v7x)
    # while keeping the whole problem small.
    B, x_dim = 512, 512
    encode_dim = [256, 128]     # small stand-in for h_dim = [1024, 128]
    z_dim = 32                  # padded to 128 inside prepare_params

    key = jax.random.PRNGKey(0)
    kx, kp = jax.random.split(key)
    x = jax.random.normal(kx, (B, x_dim), dtype=jnp.float32)

    params_f32 = init_params(kp, x_dim, encode_dim, z_dim)
    prepared = prepare_params(params_f32)

    recon = jax.block_until_ready(ae_forward(x, prepared, bm=256))

    ref = ae_forward_ref(x, params_f32)
    assert recon.shape == (B, x_dim)
    # bf16 matmul operands (f32 accumulation) -> loosened tolerance vs f32 ref.
    assert jnp.allclose(recon, ref, atol=5e-2, rtol=5e-2), "mismatch vs reference"

    print("KERNEL_OK")
</pallas_src>

<mosaic_0001>
module attributes {stable_mosaic.version = 11 : i64} {
  func.func @ae_forward_kernel(%arg0: i32, %arg1: memref<256x512xf32, #tpu.memory_space<vmem>>, %arg2: memref<512x256xbf16, #tpu.memory_space<vmem>>, %arg3: memref<1x256xf32, #tpu.memory_space<vmem>>, %arg4: memref<256x128xbf16, #tpu.memory_space<vmem>>, %arg5: memref<1x128xf32, #tpu.memory_space<vmem>>, %arg6: memref<128x128xbf16, #tpu.memory_space<vmem>>, %arg7: memref<1x128xf32, #tpu.memory_space<vmem>>, %arg8: memref<128x512xbf16, #tpu.memory_space<vmem>>, %arg9: memref<1x512xf32, #tpu.memory_space<vmem>>, %arg10: memref<256x512xf32, #tpu.memory_space<vmem>>) attributes {dimension_semantics = [#tpu.dimension_semantics<parallel>], iteration_bounds = array<i64: 2>, scalar_prefetch = 0 : i64, scratch_operands = 0 : i64, tpu.core_type = #tpu.core_type<tc>, window_params = [{transform_indices = @transform_0, window_bounds = array<i64: 256, 512>}, {pipeline_mode = #tpu.pipeline_mode<synchronous>, transform_indices = @transform_1, window_bounds = array<i64: 512, 256>}, {pipeline_mode = #tpu.pipeline_mode<synchronous>, transform_indices = @transform_2, window_bounds = array<i64: 1, 256>}, {pipeline_mode = #tpu.pipeline_mode<synchronous>, transform_indices = @transform_3, window_bounds = array<i64: 256, 128>}, {pipeline_mode = #tpu.pipeline_mode<synchronous>, transform_indices = @transform_4, window_bounds = array<i64: 1, 128>}, {pipeline_mode = #tpu.pipeline_mode<synchronous>, transform_indices = @transform_5, window_bounds = array<i64: 128, 128>}, {pipeline_mode = #tpu.pipeline_mode<synchronous>, transform_indices = @transform_6, window_bounds = array<i64: 1, 128>}, {pipeline_mode = #tpu.pipeline_mode<synchronous>, transform_indices = @transform_7, window_bounds = array<i64: 128, 512>}, {pipeline_mode = #tpu.pipeline_mode<synchronous>, transform_indices = @transform_8, window_bounds = array<i64: 1, 512>}, {transform_indices = @transform_9, window_bounds = array<i64: 256, 512>}]} {
    %c0 = arith.constant 0 : index
    %c0_0 = arith.constant 0 : index
    %0 = vector.load %arg1[%c0, %c0_0] : memref<256x512xf32, #tpu.memory_space<vmem>>, vector<256x512xf32>
    %1 = arith.truncf %0 : vector<256x512xf32> to vector<256x512xbf16>
    %c0_1 = arith.constant 0 : index
    %c0_2 = arith.constant 0 : index
    %2 = vector.load %arg2[%c0_1, %c0_2] : memref<512x256xbf16, #tpu.memory_space<vmem>>, vector<512x256xbf16>
    %cst = arith.constant dense<0.000000e+00> : vector<256x256xf32>
    %3 = tpu.matmul %1, %2, %cst {dimension_numbers = #tpu.dot_dimension_numbers<[1], [0], [0], [1], [0, 0, 1, 1], [], []>} : vector<256x512xbf16>, vector<512x256xbf16>, vector<256x256xf32> -> vector<256x256xf32>
    %c0_3 = arith.constant 0 : index
    %c0_4 = arith.constant 0 : index
    %4 = vector.load %arg3[%c0_3, %c0_4] : memref<1x256xf32, #tpu.memory_space<vmem>>, vector<1x256xf32>
    %5 = vector.broadcast %4 : vector<1x256xf32> to vector<256x256xf32>
    %6 = arith.addf %3, %5 : vector<256x256xf32>
    %cst_5 = arith.constant 0.000000e+00 : f32
    %7 = vector.broadcast %cst_5 : f32 to vector<256x256xf32>
    %8 = arith.maximumf %6, %7 : vector<256x256xf32>
    %9 = arith.truncf %8 : vector<256x256xf32> to vector<256x256xbf16>
    %c0_6 = arith.constant 0 : index
    %c0_7 = arith.constant 0 : index
    %10 = vector.load %arg4[%c0_6, %c0_7] : memref<256x128xbf16, #tpu.memory_space<vmem>>, vector<256x128xbf16>
    %cst_8 = arith.constant dense<0.000000e+00> : vector<256x128xf32>
    %11 = tpu.matmul %9, %10, %cst_8 {dimension_numbers = #tpu.dot_dimension_numbers<[1], [0], [0], [1], [0, 0, 1, 1], [], []>} : vector<256x256xbf16>, vector<256x128xbf16>, vector<256x128xf32> -> vector<256x128xf32>
    %c0_9 = arith.constant 0 : index
    %c0_10 = arith.constant 0 : index
    %12 = vector.load %arg5[%c0_9, %c0_10] : memref<1x128xf32, #tpu.memory_space<vmem>>, vector<1x128xf32>
    %13 = vector.broadcast %12 : vector<1x128xf32> to vector<256x128xf32>
    %14 = arith.addf %11, %13 : vector<256x128xf32>
    %cst_11 = arith.constant 0.000000e+00 : f32
    %15 = vector.broadcast %cst_11 : f32 to vector<256x128xf32>
    %16 = arith.maximumf %14, %15 : vector<256x128xf32>
    %17 = arith.truncf %16 : vector<256x128xf32> to vector<256x128xbf16>
    %c0_12 = arith.constant 0 : index
    %c0_13 = arith.constant 0 : index
    %18 = vector.load %arg6[%c0_12, %c0_13] : memref<128x128xbf16, #tpu.memory_space<vmem>>, vector<128x128xbf16>
    %cst_14 = arith.constant dense<0.000000e+00> : vector<256x128xf32>
    %19 = tpu.matmul %17, %18, %cst_14 {dimension_numbers = #tpu.dot_dimension_numbers<[1], [0], [0], [1], [0, 0, 1, 1], [], []>} : vector<256x128xbf16>, vector<128x128xbf16>, vector<256x128xf32> -> vector<256x128xf32>
    %c0_15 = arith.constant 0 : index
    %c0_16 = arith.constant 0 : index
    %20 = vector.load %arg7[%c0_15, %c0_16] : memref<1x128xf32, #tpu.memory_space<vmem>>, vector<1x128xf32>
    %21 = vector.broadcast %20 : vector<1x128xf32> to vector<256x128xf32>
    %22 = arith.addf %19, %21 : vector<256x128xf32>
    %cst_17 = arith.constant 0.000000e+00 : f32
    %23 = vector.broadcast %cst_17 : f32 to vector<256x128xf32>
    %24 = arith.maximumf %22, %23 : vector<256x128xf32>
    %25 = arith.truncf %24 : vector<256x128xf32> to vector<256x128xbf16>
    %c0_18 = arith.constant 0 : index
    %c0_19 = arith.constant 0 : index
    %26 = vector.load %arg8[%c0_18, %c0_19] : memref<128x512xbf16, #tpu.memory_space<vmem>>, vector<128x512xbf16>
    %cst_20 = arith.constant dense<0.000000e+00> : vector<256x512xf32>
    %27 = tpu.matmul %25, %26, %cst_20 {dimension_numbers = #tpu.dot_dimension_numbers<[1], [0], [0], [1], [0, 0, 1, 1], [], []>} : vector<256x128xbf16>, vector<128x512xbf16>, vector<256x512xf32> -> vector<256x512xf32>
    %c0_21 = arith.constant 0 : index
    %c0_22 = arith.constant 0 : index
    %28 = vector.load %arg9[%c0_21, %c0_22] : memref<1x512xf32, #tpu.memory_space<vmem>>, vector<1x512xf32>
    %29 = vector.broadcast %28 : vector<1x512xf32> to vector<256x512xf32>
    %30 = arith.addf %27, %29 : vector<256x512xf32>
    %c0_23 = arith.constant 0 : index
    %c0_24 = arith.constant 0 : index
    %31 = vector.load %arg10[%c0_23, %c0_24] : memref<256x512xf32, #tpu.memory_space<vmem>>, vector<256x512xf32>
    tpu.vector_store %arg10[%c0_23, %c0_24], %30 {strides = array<i32>} : memref<256x512xf32, #tpu.memory_space<vmem>>, vector<256x512xf32>,
    return
  }
  func.func @transform_0(%arg0: i32) -> (i32, i32) {
    %c0_i32 = arith.constant 0 : i32
    %c0_i32_0 = arith.constant 0 : i32
    return %arg0, %c0_i32 : i32, i32
  }
  func.func @transform_1(%arg0: i32) -> (i32, i32) {
    %c0_i32 = arith.constant 0 : i32
    %c0_i32_0 = arith.constant 0 : i32
    %c0_i32_1 = arith.constant 0 : i32
    return %c0_i32, %c0_i32_0 : i32, i32
  }
  func.func @transform_2(%arg0: i32) -> (i32, i32) {
    %c0_i32 = arith.constant 0 : i32
    %c0_i32_0 = arith.constant 0 : i32
    %c0_i32_1 = arith.constant 0 : i32
    return %c0_i32, %c0_i32_0 : i32, i32
  }
  func.func @transform_3(%arg0: i32) -> (i32, i32) {
    %c0_i32 = arith.constant 0 : i32
    %c0_i32_0 = arith.constant 0 : i32
    %c0_i32_1 = arith.constant 0 : i32
    return %c0_i32, %c0_i32_0 : i32, i32
  }
  func.func @transform_4(%arg0: i32) -> (i32, i32) {
    %c0_i32 = arith.constant 0 : i32
    %c0_i32_0 = arith.constant 0 : i32
    %c0_i32_1 = arith.constant 0 : i32
    return %c0_i32, %c0_i32_0 : i32, i32
  }
  func.func @transform_5(%arg0: i32) -> (i32, i32) {
    %c0_i32 = arith.constant 0 : i32
    %c0_i32_0 = arith.constant 0 : i32
    %c0_i32_1 = arith.constant 0 : i32
    return %c0_i32, %c0_i32_0 : i32, i32
  }
  func.func @transform_6(%arg0: i32) -> (i32, i32) {
    %c0_i32 = arith.constant 0 : i32
    %c0_i32_0 = arith.constant 0 : i32
    %c0_i32_1 = arith.constant 0 : i32
    return %c0_i32, %c0_i32_0 : i32, i32
  }
  func.func @transform_7(%arg0: i32) -> (i32, i32) {
    %c0_i32 = arith.constant 0 : i32
    %c0_i32_0 = arith.constant 0 : i32
    %c0_i32_1 = arith.constant 0 : i32
    return %c0_i32, %c0_i32_0 : i32, i32
  }
  func.func @transform_8(%arg0: i32) -> (i32, i32) {
    %c0_i32 = arith.constant 0 : i32
    %c0_i32_0 = arith.constant 0 : i32
    %c0_i32_1 = arith.constant 0 : i32
    return %c0_i32, %c0_i32_0 : i32, i32
  }
  func.func @transform_9(%arg0: i32) -> (i32, i32) {
    %c0_i32 = arith.constant 0 : i32
    %c0_i32_0 = arith.constant 0 : i32
    return %arg0, %c0_i32 : i32, i32
  }
}

</mosaic_0001>

<bundles_post_ra>
// kernel: tpu_custom_call.1
= control target key start
LH: loop header
LB: loop body
LE: loop exit
PB: predicated region body
PF: predicated region fallthrough
CT: control target
= control target key end

     0   :  { %s4909_s0 = inlined_call_operand.hbm [shape: f32[512,512], index: 0, kind: input, shape index: {}]   ;;  %s4910_s1 = inlined_call_operand.hbm [shape: bf16[512,256], index: 1, kind: input, shape index: {}]   ;;  %s4911_s2 = inlined_call_operand.vmem [shape: f32[1,256], index: 2, kind: input, shape index: {}]   ;;  %s4912_s3 = inlined_call_operand.hbm [shape: bf16[256,128], index: 3, kind: input, shape index: {}]   ;;  %s4913_s4 = inlined_call_operand.vmem [shape: f32[1,128], index: 4, kind: input, shape index: {}]   ;;  %s4914_s5 = inlined_call_operand.hbm [shape: bf16[128,128], index: 5, kind: input, shape index: {}]   ;;  %s4915_s6 = inlined_call_operand.vmem [shape: f32[1,128], index: 6, kind: input, shape index: {}]   ;;  %s4916_s7 = inlined_call_operand.hbm [shape: bf16[128,512], index: 7, kind: input, shape index: {}]   ;;  %s4917_s8 = inlined_call_operand.vmem [shape: f32[1,512], index: 8, kind: input, shape index: {}]   ;;  %s4918_s9 = inlined_call_operand.hbm [shape: f32[512,512], index: 9, kind: output, shape index: {}]  }
   0x1   :  { %4925 = sst [smem:[#allocation18_spill]] %s4917_s8 }
   0x2   :  { %4926 = sst [smem:[#allocation19_spill]] %s4918_s9 }
   0x3   :  { %14 = vsyncpa [#allocation3], 0 }
   0x4   :  { %16 = vsyncpa [#allocation3 + $0x1], 0 }
   0x5   :  { %17 = vsyncpa [#allocation6], 0 }
   0x6   :  { %18 = vsyncpa [#allocation9], 0 }
   0x7   :  { %19 = vsyncpa [#allocation4], 0 }
   0x8   :  { %21 = vsyncpa [#allocation4 + $0x1], 0  ;;  %s3990_s30 = smov 0   ;;  %s3992_s10 = smov 0  }
   0x9   :  { %s3994_s11 = smov 0   ;;  %s3996_s12 = smov 0  }
   0xa LB: > { %4927 = sst [smem:[#allocation16_spill]] %s3909_s30  ;;  %s4011_s13 = sadd.s32 4294967295, %s3921_s12   ;;  %s3921_s12 = sphi %s3996_s12, %s4952_s12   ;;  %s3917_s11 = sphi %s3994_s11, %s4951_s11   ;;  %s3913_s10 = sphi %s3992_s10, %s4950_s10   ;;  %s3909_s30 = sphi %s3990_s30, %s4949_s30  }
   0xb   : > { %s2961_s14 = sadd.s32 4294967294, %s3921_s12   ;;  %p47_p0 = scmp.ne.s32.totalorder %s3913_s10, %s3909_s30 }
   0xc   : > { %p4919_p1 = scmp.eq.s32.totalorder %s4011_s13, 0  ;;  %p245_p3 = scmp.eq.s32.totalorder %s2961_s14, 1 }
   0xd   : > { %p2962_p5 = scmp.ge.s32.totalorder %s3921_s12, 1  ;;  %p252_p7 = scmp.lt.s32.totalorder %s3921_s12, 3 }
   0xe   : > { %p4020_p4 = por %p4919_p1, %p47_p0  ;;  %p4025_p6 = por %p245_p3, %p47_p0 }
   0xf   : > { %p4030_p8 = pnand %p2962_p5, %p252_p7  ;;  %s3923_s18 = smov [#allocation5]  }
  0x10   : > { %s4928_s15 = scalar_select %p4020_p4, 1, 0 }
  0x11   : > { %s4929_s16 = scalar_select %p4025_p6, 1, 0 }
  0x12   : > { %s4931_s17 = scalar_select %p4030_p8, 1, 0 }
  0x13   : > { %4930 = sst [smem:[#allocation17_spill]] %s4929_s16  ;;  %s264_s19 = sshll.u32 %s3923_s18, 4  ;;  %s265_s19 = int_to_ptr.vmem [resolvable:$true] %s264_s19 }
  0x14   : > { %p3459_p9 = pneg %p4030_p8  ;;  %s3924_s21 = smov [#allocation8]  }
  0x15   : > { %s296_s22 = sshll.u32 %s3924_s21, 4  ;;  %s3705_s25 = scalar_lea.hbm %s4910_s1, 8192  ;;  %s297_s22 = int_to_ptr.vmem [resolvable:$true] %s296_s22 }
  0x16   : > { %p4039_p11 = pnand %p3459_p9, %p4919_p1  ;;  %p3706_p12 = scmp.ne.s32.totalorder %s4910_s1, %s3705_s25 }
  0x17   : > { %p3712_p5 = scmp.lt.u32.totalorder %s3705_s25, %s4910_s1 }
  0x18   : > { %p4051_p13 = pneg %p4039_p11 }
  0x1a   : > { %p3708_p0 = pnand %p4051_p13, %p3706_p12 }
  0x1c   : > { %p3709_p3 = pneg %p3708_p0 }
  0x1e   : > { %p3714_p7 = pnand %p3712_p5, %p3709_p3 }
  0x20   : > { %3717 = shalt.err (!%p3714_p7)
}
  0x21   : > { %s3718_s18 = scalar_lea.vmem %s265_s19, 8192  ;;  %p3726_p2 = scmp.lt.s32.totalorder %s265_s19, %s265_s19 }
  0x22   : > { %p3719_p9 = scmp.ne.s32.totalorder %s265_s19, %s3718_s18  ;;  %p3727_p6 = scmp.lt.s32.totalorder %s3718_s18, %s3718_s18 }
  0x24   : > { %p3721_p10 = pnand %p3719_p9, %p4051_p13  ;;  %p3728_p4 = por %p3727_p6, %p3726_p2 }
  0x26   : > { %p3722_p1 = pneg %p3721_p10 }
  0x28   : > { %p3729_p8 = pnand %p3728_p4, %p3722_p1 }
  0x2a   : > { %3732 = shalt.err (!%p3729_p8)
}
  0x2b   : > { %s3925_s21 = smov 128   ;;  %s3926_s23 = smov 8  }
  0x2c   : > { %3462 = dma.hbm_to_vmem [thread:$0]  (!%p4039_p11), %s4910_s1, 8192, %s265_s19, [#allocation6], %s3925_s21, %s3925_s21, %s3926_s23  }
  0x2d   : > { %s3927_s26 = smov [#allocation7]   ;;  %s3733_s16 = scalar_lea.hbm %s4914_s5, 1024 }
  0x2e   : > { %s280_s27 = sshll.u32 %s3927_s26, 4  ;;  %p3734_p1 = scmp.ne.s32.totalorder %s4914_s5, %s3733_s16  ;;  %s281_s27 = int_to_ptr.vmem [resolvable:$true] %s280_s27 }
  0x2f   : > { %p3740_p6 = scmp.lt.u32.totalorder %s3733_s16, %s4914_s5 }
  0x30   : > { %p3736_p2 = pnand %p3734_p1, %p4051_p13 }
  0x32   : > { %p3737_p4 = pneg %p3736_p2 }
  0x34   : > { %p3742_p8 = pnand %p3740_p6, %p3737_p4 }
  0x36   : > { %3745 = shalt.err (!%p3742_p8)
}
  0x37   : > { %s3746_s19 = scalar_lea.vmem %s297_s22, 1024  ;;  %p3754_p3 = scmp.lt.s32.totalorder %s297_s22, %s297_s22 }
  0x38   : > { %p3747_p10 = scmp.ne.s32.totalorder %s297_s22, %s3746_s19  ;;  %p3755_p5 = scmp.lt.s32.totalorder %s3746_s19, %s3746_s19 }
  0x3a   : > { %p3749_p12 = pnand %p3747_p10, %p4051_p13  ;;  %p3756_p7 = por %p3755_p5, %p3754_p3 }
  0x3c   : > { %p3750_p0 = pneg %p3749_p12 }
  0x3e   : > { %p3757_p9 = pnand %p3756_p7, %p3750_p0 }
  0x40   : > { %3760 = shalt.err (!%p3757_p9)
}
  0x41   : > { %s3928_s30 = smov 64   ;;  %s3929_s21 = smov 4  }
  0x42   : > { %3468 = dma.hbm_to_vmem [thread:$0]  (!%p4039_p11), %s4914_s5, 1024, %s297_s22, [#allocation9], %s3928_s30, %s3928_s30, %s3929_s21  }
  0x43   : > { %s3761_s24 = scalar_lea.hbm %s4912_s3, 2048 }
  0x44   : > { %p3762_p1 = scmp.ne.s32.totalorder %s4912_s3, %s3761_s24  ;;  %p3768_p6 = scmp.lt.u32.totalorder %s3761_s24, %s4912_s3 }
  0x46   : > { %p3764_p2 = pnand %p3762_p1, %p4051_p13 }
  0x48   : > { %p3765_p4 = pneg %p3764_p2 }
  0x4a   : > { %p3770_p8 = pnand %p3768_p6, %p3765_p4 }
  0x4c   : > { %3773 = shalt.err (!%p3770_p8)
}
  0x4d   : > { %s3774_s18 = scalar_lea.vmem %s281_s27, 2048  ;;  %p3782_p3 = scmp.lt.s32.totalorder %s281_s27, %s281_s27 }
  0x4e   : > { %p3775_p10 = scmp.ne.s32.totalorder %s281_s27, %s3774_s18  ;;  %p3783_p5 = scmp.lt.s32.totalorder %s3774_s18, %s3774_s18 }
  0x50   : > { %p3777_p12 = pnand %p3775_p10, %p4051_p13  ;;  %p3784_p7 = por %p3783_p5, %p3782_p3 }
  0x52   : > { %p3778_p0 = pneg %p3777_p12 }
  0x54   : > { %p3785_p9 = pnand %p3784_p7, %p3778_p0 }
  0x56   : > { %3788 = shalt.err (!%p3785_p9)
}
  0x57   : > { %3465 = dma.hbm_to_vmem [thread:$0]  (!%p4039_p11), %s4912_s3, 2048, %s281_s27, [#allocation6], %s3928_s30, %s3928_s30, %s3929_s21  }
  0x58   : > { %s3930_s8 = smov [#allocation10]   ;;  %s3789_s24 = scalar_lea.hbm %s4916_s7, 4096 }
  0x59   : > { %s312_s9 = sshll.u32 %s3930_s8, 4  ;;  %p3790_p1 = scmp.ne.s32.totalorder %s4916_s7, %s3789_s24  ;;  %s313_s9 = int_to_ptr.vmem [resolvable:$true] %s312_s9 }
  0x5a   : > { %p3796_p6 = scmp.lt.u32.totalorder %s3789_s24, %s4916_s7 }
  0x5b   : > { %p3792_p2 = pnand %p3790_p1, %p4051_p13 }
  0x5d   : > { %p3793_p4 = pneg %p3792_p2 }
  0x5f   : > { %p3798_p8 = pnand %p3796_p6, %p3793_p4 }
  0x61   : > { %3801 = shalt.err (!%p3798_p8)
}
  0x62   : > { %s3802_s27 = scalar_lea.vmem %s313_s9, 4096  ;;  %p3810_p3 = scmp.lt.s32.totalorder %s313_s9, %s313_s9 }
  0x63   : > { %p3803_p10 = scmp.ne.s32.totalorder %s313_s9, %s3802_s27  ;;  %p3811_p5 = scmp.lt.s32.totalorder %s3802_s27, %s3802_s27 }
  0x65   : > { %p3805_p12 = pnand %p3803_p10, %p4051_p13  ;;  %p3812_p7 = por %p3811_p5, %p3810_p3 }
  0x67   : > { %p3806_p0 = pneg %p3805_p12 }
  0x69   : > { %p3813_p9 = pnand %p3812_p7, %p3806_p0 }
  0x6b   : > { %3816 = shalt.err (!%p3813_p9)
}
  0x6c   : > { %s3931_s30 = smov 256   ;;  %s3932_s28 = smov 16  }
  0x6d   : > { %3471 = dma.hbm_to_vmem [thread:$0]  (!%p4039_p11), %s4916_s7, 4096, %s313_s9, [#allocation9], %s3931_s30, %s3931_s30, %s3932_s28  }
  0x6e   : > { %s4122_s22 = sadd.s32 1, %s3921_s12   ;;  %s34_s8 = sadd.s32 1, %s3917_s11 }
  0x6f   : > { %s31_s19 = ssub.s32 %s3921_s12, %s4122_s22  ;;  %p41_p1 = scmp.ne.s32.totalorder %s3917_s11, %s3913_s10 }
  0x70   : > { %p32_p13 = scmp.eq.s32.totalorder %s31_s19, 0  ;;  %p42_p2 = scmp.eq.s32.totalorder %s3921_s12, 0 }
  0x71   : > { %p4934_p6 = scmp.eq.s32.totalorder %s4011_s13, 1  ;;  %p3484_p10 = scmp.lt.s32.totalorder %s3921_s12, 2 }
  0x72   : > { %s4131_s16 = scalar_select %p32_p13, %s3917_s11, %s34_s8  }
  0x73   : > { %p43_p4 = por %p42_p2, %p41_p1  ;;  %p4135_p8 = por %p4934_p6, %p41_p1 }
  0x74   : > { %s329_s20 = sand.u32 1, %s3917_s11   ;;  %s3108_s9 = sshll.u32 %s3921_s12, 14 }
  0x75   : > { %s2968_s24 = sshll.u32 %s329_s20, 10  ;;  %s4145_s29 = scalar_lea.hbm %s4909_s0, %s3108_s9 }
  0x76   : > { %s333_s14 = scalar_lea.vmem [#allocation2], %s2968_s24  ;;  %p4149_p11 = pnand %p3484_p10, %p43_p4 }
  0x77   : > { %s341_s27 = sshll.u32 %s333_s14, 4  ;;  %s4153_s28 = scalar_lea.sflag [#allocation3], %s329_s20  ;;  %s4147_s27 = int_to_ptr.vmem [resolvable:$true] %s341_s27 }
  0x78   : > { %s3817_s21 = scalar_lea.hbm %s4145_s29, 16384  ;;  %p3819_p0 = pneg %p4149_p11 }
  0x79   : > { %p3818_p12 = scmp.ne.s32.totalorder %s4145_s29, %s3817_s21  ;;  %s3822_s8 = scalar_lea.hbm %s4909_s0, 32768 }
  0x7a   : > { %p3823_p7 = scmp.lt.u32.totalorder %s4145_s29, %s4909_s0  ;;  %p3824_p9 = scmp.lt.u32.totalorder %s3822_s8, %s3817_s21 }
  0x7b   : > { %p3820_p3 = pnand %p3819_p0, %p3818_p12  ;;  %p3826_p1 = scmp.lt.u32.totalorder %s3817_s21, %s4145_s29 }
  0x7c   : > { %p3825_p13 = por %p3824_p9, %p3823_p7 }
  0x7d   : > { %p3821_p5 = pneg %p3820_p3 }
  0x7e   : > { %p3827_p2 = por %p3826_p1, %p3825_p13 }
  0x80   : > { %p3828_p4 = pnand %p3827_p2, %p3821_p5 }
  0x82   : > { %3831 = shalt.err (!%p3828_p4)
}
  0x83   : > { %s3832_s20 = scalar_lea.vmem %s4147_s27, 16384  ;;  %s3933_s25 = smov [#allocation2]  }
  0x84   : > { %p3833_p6 = scmp.ne.s32.totalorder %s4147_s27, %s3832_s20  ;;  %s3837_s26 = sshll.u32 %s3933_s25, 4  ;;  %s3838_s26 = int_to_ptr.vmem [resolvable:$false] %s3837_s26 }
  0x85   : > { %s3839_s14 = scalar_lea.vmem %s3838_s26, 32768  ;;  %p3840_p3 = scmp.lt.s32.totalorder %s4147_s27, %s3838_s26 }
  0x86   : > { %p3835_p10 = pnand %p3833_p6, %p3819_p0  ;;  %p3841_p7 = scmp.lt.s32.totalorder %s3839_s14, %s3832_s20 }
  0x88   : > { %p3836_p12 = pneg %p3835_p10  ;;  %p3842_p9 = por %p3841_p7, %p3840_p3 }
  0x8a   : > { %p3843_p13 = pnand %p3842_p9, %p3836_p12 }
  0x8c   : > { %3846 = shalt.err (!%p3843_p13)
}
  0x8d   : > { %s3934_s21 = smov 512   ;;  %s3935_s18 = smov 32  }
  0x8e   : > { %3475 = dma.hbm_to_vmem [thread:$0]  (!%p4149_p11), %s4145_s29, 16384, %s4147_s27, %s4153_s28, %s3934_s21, %s3934_s21, %s3935_s18  }
  0x8f   : > { %p4937_p0 = scmp.ne.s32.totalorder %s4931_s17, 0 }
  0x90   : > { %s4184_s19 = sand.u32 (!%p4937_p0), 1, %s3913_s10   ;;  %p4938_p5 = scmp.ne.s32.totalorder (!%p4937_p0), %s4928_s15, 0 }
  0x91   : > { %353 = sbr.rel (%p4937_p0) target bundleno = 1427 (0x593), region = 56  ;;  %s2973_s8 = sshll.u32 (!%p4937_p0), %s4184_s19, 10 }
  0x92   : > { %s356_s24 = scalar_lea.sflag (!%p4937_p0), [#allocation3], %s4184_s19  ;;  %s4190_s9 = scalar_lea.vmem (!%p4937_p0), [#allocation2], %s2973_s8 }
  0x98   : > { %3892 = dma.done.wait (%p4938_p5), %s356_s24, 16384  }
  0x99   : > { %3894 = vsyncadd (%p4938_p5), %s356_s24, 4294950912  ;;  %p4939_p11 = scmp.eq.s32.totalorder %s4011_s13, 0 }
  0x9b   : > { %3896 = dma.done.wait (%p4939_p11), [#allocation6], 10240   ;;  %p4940_p1 = pmov %p4939_p11 }
  0x9d   : > { %3898 = vsyncadd (%p4940_p1), [#allocation6], 4294957056  ;;  %p4941_p2 = pmov %p4940_p1 }
  0x9e   : > { %p4942_p4 = pmov %p4940_p1 }
  0x9f   : > { %3900 = dma.done.wait (%p4941_p2), [#allocation9], 5120  }
  0xa0   : > { %3902 = vsyncadd (%p4942_p4), [#allocation9], 4294962176  ;;  %v3537_v0 = vld [vmem:[#allocation5 + $0x4] ss:$8 sps:$4 sm:$0xff]   ;;  %v3539_v1 = vld [vmem:[#allocation5] ss:$8 sps:$4 sm:$0xff]  }
  0xa1   : > { %1001 = vmatprep.subr.bf16.mxu0 %v3537_v0  ;;  %v3540_v2 = vld [vmem:[#allocation5 + $0x14] ss:$8 sps:$4 sm:$0xff]   ;;  %v3542_v3 = vld [vmem:[#allocation5 + $0x10] ss:$8 sps:$4 sm:$0xff]   ;;  %v3543_v4 = vld [vmem:[#allocation5 + $0x24] ss:$8 sps:$4 sm:$0xff]  }
  0xa2   : > { %1002 = vmatpush1.bf16.msra.mxu0 %v3539_v1  ;;  %v3545_v5 = vld [vmem:[#allocation5 + $0x20] ss:$8 sps:$4 sm:$0xff]   ;;  %v3546_v6 = vld [vmem:[#allocation5 + $0x34] ss:$8 sps:$4 sm:$0xff]   ;;  %v3548_v7 = vld [vmem:[#allocation5 + $0x30] ss:$8 sps:$4 sm:$0xff]  }
  0xa3   : > { %1003 = vmatprep.subr.bf16.mxu0 %v3540_v2  ;;  %v3549_v8 = vld [vmem:[#allocation5 + $0x44] ss:$8 sps:$4 sm:$0xff]   ;;  %v3551_v9 = vld [vmem:[#allocation5 + $0x40] ss:$8 sps:$4 sm:$0xff]   ;;  %v3552_v10 = vld [vmem:[#allocation5 + $0x54] ss:$8 sps:$4 sm:$0xff]  }
  0xa4   : > { %v3554_v11 = vld [vmem:[#allocation5 + $0x50] ss:$8 sps:$4 sm:$0xff]   ;;  %v3555_v12 = vld [vmem:[#allocation5 + $0x64] ss:$8 sps:$4 sm:$0xff]   ;;  %v3557_v16 = vld [vmem:[#allocation5 + $0x60] ss:$8 sps:$4 sm:$0xff]  }
  0xa5   : > { %v414_v13 = vld [vmem:[%s4190_s9 + $0x8] sm:$0xff]  ;;  %v3558_v17 = vld [vmem:[#allocation5 + $0x74] ss:$8 sps:$4 sm:$0xff]   ;;  %v3560_v18 = vld [vmem:[#allocation5 + $0x70] ss:$8 sps:$4 sm:$0xff]   ;;  %s4943_s26 = sld [smem:[#allocation18_spill]] }
  0xa6   : > { %1004 = vmatpush1.bf16.msra.mxu0 %v3542_v3  ;;  %v418_v14 = vld [vmem:[%s4190_s9 + $0x28] sm:$0xff]  ;;  %v3564_v21 = vld [vmem:[#allocation5 + $0x94] ss:$8 sps:$4 sm:$0xff]   ;;  %v3566_v22 = vld [vmem:[#allocation5 + $0x90] ss:$8 sps:$4 sm:$0xff]   ;;  %s4604_s14 = scalar_lea.vmem [#allocation11], %s2973_s8 }
  0xa7   : > { %1005 = vmatprep.subr.bf16.mxu0 %v3543_v4  ;;  %v542_v15 = vpack.c.bf16 %v418_v14, %v414_v13  ;;  %v3561_v19 = vld [vmem:[#allocation5 + $0x84] ss:$8 sps:$4 sm:$0xff]   ;;  %v3563_v20 = vld [vmem:[#allocation5 + $0x80] ss:$8 sps:$4 sm:$0xff]   ;;  %v3570_v25 = vld [vmem:[#allocation5 + $0xb4] ss:$8 sps:$4 sm:$0xff]  }
  0xa8   : > { %v3567_v23 = vld [vmem:[#allocation5 + $0xa4] ss:$8 sps:$4 sm:$0xff]   ;;  %v3569_v24 = vld [vmem:[#allocation5 + $0xa0] ss:$8 sps:$4 sm:$0xff]   ;;  %v3572_v26 = vld [vmem:[#allocation5 + $0xb0] ss:$8 sps:$4 sm:$0xff]  }
  0xa9   : > { %1033 = vmatprep.mubr.bf16.mxu0 %v542_v15  ;;  %v3573_v27 = vld [vmem:[#allocation5 + $0xc4] ss:$8 sps:$4 sm:$0xff]   ;;  %v3575_v28 = vld [vmem:[#allocation5 + $0xc0] ss:$8 sps:$4 sm:$0xff]   ;;  %v3576_v29 = vld [vmem:[#allocation5 + $0xd4] ss:$8 sps:$4 sm:$0xff]  }
  0xaa   : > { %1006 = vmatpush1.bf16.msra.mxu0 %v3545_v5  ;;  %v3578_v30 = vld [vmem:[#allocation5 + $0xd0] ss:$8 sps:$4 sm:$0xff]   ;;  %v3579_v31 = vld [vmem:[#allocation5 + $0xe4] ss:$8 sps:$4 sm:$0xff]   ;;  %v3581_v32 = vld [vmem:[#allocation5 + $0xe0] ss:$8 sps:$4 sm:$0xff]  }
  0xab   : > { %1007 = vmatprep.subr.bf16.mxu0 %v3546_v6  ;;  %v3582_v33 = vld [vmem:[#allocation5 + $0xf4] ss:$8 sps:$4 sm:$0xff]   ;;  %v3584_v34 = vld [vmem:[#allocation5 + $0xf0] ss:$8 sps:$4 sm:$0xff]   ;;  %v413_v35 = vld [vmem:[%s4190_s9] sm:$0xff]  ;;  %s3110_s21 = sshll.u32 %s4011_s13, 14 }
  0xac   : > { %v417_v36 = vld [vmem:[%s4190_s9 + $0x20] sm:$0xff]  ;;  %v422_v38 = vld [vmem:[%s4190_s9 + $0x48] sm:$0xff]  ;;  %v3590_v43 = vld [vmem:[#allocation5 + $0x114] ss:$8 sps:$4 sm:$0xff]   ;;  %s2850_s18 = sshll.u32 %s4604_s14, 4  ;;  %s2836_s13 = scalar_lea.sflag [#allocation4], %s4184_s19  ;;  %s4861_s18 = int_to_ptr.vmem [resolvable:$true] %s2850_s18 }
  0xad   : > { %v3587_v37 = vld [vmem:[#allocation5 + $0x104] ss:$8 sps:$4 sm:$0xff]   ;;  %v541_v40 = vpack.c.bf16 %v417_v36, %v413_v35  ;;  %v3585_v41 = vld [vmem:[#allocation5 + $0x100] ss:$8 sps:$4 sm:$0xff]   ;;  %v3588_v46 = vld [vmem:[#allocation5 + $0x110] ss:$8 sps:$4 sm:$0xff]  }
  0xae   : > { %1008 = vmatpush1.bf16.msra.mxu0 %v3548_v7  ;;  %v426_v39 = vld [vmem:[%s4190_s9 + $0x68] sm:$0xff]  ;;  %v421_v44 = vld [vmem:[%s4190_s9 + $0x40] sm:$0xff]  ;;  %v3596_v52 = vld [vmem:[#allocation5 + $0x134] ss:$8 sps:$4 sm:$0xff]   ;;  %s3847_s17 = scalar_lea.vmem %s4861_s18, 16384  ;;  %s3937_s29 = smov [#allocation11]  }
  0xaf   : > { %1009 = vmatprep.subr.bf16.mxu0 %v3549_v8  ;;  %v546_v42 = vpack.c.bf16 %v426_v39, %v422_v38  ;;  %v425_v45 = vld [vmem:[%s4190_s9 + $0x60] sm:$0xff]  ;;  %v430_v47 = vld [vmem:[%s4190_s9 + $0x88] sm:$0xff]  ;;  %v3594_v58 = vld [vmem:[#allocation5 + $0x130] ss:$8 sps:$4 sm:$0xff]   ;;  %p3848_p6 = scmp.ne.s32.totalorder %s4861_s18, %s3847_s17  ;;  %s3851_s27 = sshll.u32 %s3937_s29, 4  ;;  %s3852_s27 = int_to_ptr.vmem [resolvable:$false] %s3851_s27 }
  0xb0   : > { %v434_v48 = vld [vmem:[%s4190_s9 + $0xa8] sm:$0xff]  ;;  %v545_v51 = vpack.c.bf16 %v425_v45, %v421_v44  ;;  %v429_v54 = vld [vmem:[%s4190_s9 + $0x80] sm:$0xff]  ;;  %v3602_v62 = vld [vmem:[#allocation5 + $0x154] ss:$8 sps:$4 sm:$0xff]   ;;  %s3853_s30 = scalar_lea.vmem %s3852_s27, 32768  ;;  %p3854_p3 = scmp.lt.s32.totalorder %s4861_s18, %s3852_s27 }
  0xb1   : > { %v3593_v49 = vld [vmem:[#allocation5 + $0x124] ss:$8 sps:$4 sm:$0xff]   ;;  %v3591_v50 = vld [vmem:[#allocation5 + $0x120] ss:$8 sps:$4 sm:$0xff]   ;;  %v550_v53 = vpack.c.bf16 %v434_v48, %v430_v47  ;;  %v3600_v4 = vld [vmem:[#allocation5 + $0x150] ss:$8 sps:$4 sm:$0xff]   ;;  %p3849_p10 = pnand %p3848_p6, %p4135_p8  ;;  %p3855_p7 = scmp.lt.s32.totalorder %s3853_s30, %s3847_s17 }
  0xb2   : > { %1010 = vmatpush1.bf16.msra.mxu0 %v3551_v9  ;;  %v433_v55 = vld [vmem:[%s4190_s9 + $0xa0] sm:$0xff]  ;;  %v438_v56 = vld [vmem:[%s4190_s9 + $0xc8] sm:$0xff]  ;;  %v3608_v8 = vld [vmem:[#allocation5 + $0x174] ss:$8 sps:$4 sm:$0xff]  }
  0xb3   : > { %1011 = vmatprep.subr.bf16.mxu0 %v3552_v10  ;;  %v442_v57 = vld [vmem:[%s4190_s9 + $0xe8] sm:$0xff]  ;;  %v549_v61 = vpack.c.bf16 %v433_v55, %v429_v54  ;;  %v437_v0 = vld [vmem:[%s4190_s9 + $0xc0] sm:$0xff]  ;;  %v3606_v14 = vld [vmem:[#allocation5 + $0x170] ss:$8 sps:$4 sm:$0xff]   ;;  %p3850_p12 = pneg %p3849_p10  ;;  %p3856_p9 = por %p3855_p7, %p3854_p3 }
  0xb4   : > { %v3599_v59 = vld [vmem:[#allocation5 + $0x144] ss:$8 sps:$4 sm:$0xff]   ;;  %v3597_v60 = vld [vmem:[#allocation5 + $0x140] ss:$8 sps:$4 sm:$0xff]   ;;  %v554_v63 = vpack.c.bf16 %v442_v57, %v438_v56  ;;  %v3626_v39 = vld [vmem:[#allocation5 + $0x1d4] ss:$8 sps:$4 sm:$0xff]  }
  0xb5   : > { %v441_v1 = vld [vmem:[%s4190_s9 + $0xe0] sm:$0xff]  ;;  %v446_v2 = vld [vmem:[%s4190_s9 + $0x108] sm:$0xff]  ;;  %p3857_p13 = pnand %p3856_p9, %p3850_p12 }
  0xb6   : > { %1012 = vmatpush1.bf16.msra.mxu0 %v3554_v11  ;;  %v450_v3 = vld [vmem:[%s4190_s9 + $0x128] sm:$0xff]  ;;  %v553_v7 = vpack.c.bf16 %v441_v1, %v437_v0  ;;  %v445_v10 = vld [vmem:[%s4190_s9 + $0x100] sm:$0xff] }
  0xb7   : > { %1013 = vmatprep.subr.bf16.mxu0 %v3555_v12  ;;  %v3605_v5 = vld [vmem:[#allocation5 + $0x164] ss:$8 sps:$4 sm:$0xff]   ;;  %v3603_v6 = vld [vmem:[#allocation5 + $0x160] ss:$8 sps:$4 sm:$0xff]   ;;  %v558_v9 = vpack.c.bf16 %v450_v3, %v446_v2 }
  0xb8   : > { %v449_v11 = vld [vmem:[%s4190_s9 + $0x120] sm:$0xff]  ;;  %v454_v12 = vld [vmem:[%s4190_s9 + $0x148] sm:$0xff] }
  0xb9   : > { %v458_v13 = vld [vmem:[%s4190_s9 + $0x168] sm:$0xff]  ;;  %v485_v57 = vld [vmem:[%s4190_s9 + $0x240] sm:$0xff] }
  0xba   : > { %1014 = vmatpush1.bf16.msra.mxu0 %v3557_v16  ;;  %v3611_v15 = vld [vmem:[#allocation5 + $0x184] ss:$8 sps:$4 sm:$0xff]   ;;  %v3609_v16 = vld [vmem:[#allocation5 + $0x180] ss:$8 sps:$4 sm:$0xff]  }
  0xbb   : > { %1015 = vmatprep.subr.bf16.mxu0 %v3558_v17  ;;  %v557_v17 = vpack.c.bf16 %v449_v11, %v445_v10  ;;  %v3623_v35 = vld [vmem:[#allocation5 + $0x1c4] ss:$8 sps:$4 sm:$0xff]   ;;  %v3621_v38 = vld [vmem:[#allocation5 + $0x1c0] ss:$8 sps:$4 sm:$0xff]  }
  0xbc   : > { %v482_v44 = vld [vmem:[%s4190_s9 + $0x228] sm:$0xff]  ;;  %v497_v0 = vld [vmem:[%s4190_s9 + $0x2a0] sm:$0xff] }
  0xbd   : > { %v3629_v45 = vld [vmem:[#allocation5 + $0x1e4] ss:$8 sps:$4 sm:$0xff]   ;;  %v3627_v48 = vld [vmem:[#allocation5 + $0x1e0] ss:$8 sps:$4 sm:$0xff]  }
  0xbe   : > { %1016 = vmatpush1.bf16.msra.mxu0 %v3560_v18  ;;  %v3614_v18 = vld [vmem:[#allocation5 + $0x194] ss:$8 sps:$4 sm:$0xff]   ;;  %v490_v54 = vld [vmem:[%s4190_s9 + $0x268] sm:$0xff]  ;;  %v509_v11 = vld [vmem:[%s4190_s9 + $0x300] sm:$0xff] }
  0xbf   : > { %1017 = vmatprep.subr.bf16.mxu0 %v3561_v19  ;;  %v562_v19 = vpack.c.bf16 %v458_v13, %v454_v12  ;;  %v502_v1 = vld [vmem:[%s4190_s9 + $0x2c8] sm:$0xff]  ;;  %v513_v12 = vld [vmem:[%s4190_s9 + $0x320] sm:$0xff] }
  0xc0   : > { %v506_v2 = vld [vmem:[%s4190_s9 + $0x2e8] sm:$0xff] }
  0xc1   : > { %v518_v13 = vld [vmem:[%s4190_s9 + $0x348] sm:$0xff] }
  0xc2   : > { %1018 = vmatpush1.bf16.msra.mxu0 %v3563_v20  ;;  %v453_v20 = vld [vmem:[%s4190_s9 + $0x140] sm:$0xff] }
  0xc3   : > { %1019 = vmatprep.subr.bf16.mxu0 %v3564_v21  ;;  %v457_v21 = vld [vmem:[%s4190_s9 + $0x160] sm:$0xff] }
  0xc6   : > { %1020 = vmatpush1.bf16.msra.mxu0 %v3566_v22  ;;  %v3612_v22 = vld [vmem:[#allocation5 + $0x190] ss:$8 sps:$4 sm:$0xff]  }
  0xc7   : > { %1021 = vmatprep.subr.bf16.mxu0 %v3567_v23  ;;  %v462_v23 = vld [vmem:[%s4190_s9 + $0x188] sm:$0xff] }
  0xca   : > { %1022 = vmatpush1.bf16.msra.mxu0 %v3569_v24  ;;  %v466_v24 = vld [vmem:[%s4190_s9 + $0x1a8] sm:$0xff] }
  0xcb   : > { %1023 = vmatprep.subr.bf16.mxu0 %v3570_v25  ;;  %v3617_v25 = vld [vmem:[#allocation5 + $0x1a4] ss:$8 sps:$4 sm:$0xff]  }
  0xce   : > { %1024 = vmatpush1.bf16.msra.mxu0 %v3572_v26  ;;  %v561_v26 = vpack.c.bf16 %v457_v21, %v453_v20  ;;  %v530_v20 = vld [vmem:[%s4190_s9 + $0x3a8] sm:$0xff] }
  0xcf   : > { %1025 = vmatprep.subr.bf16.mxu0 %v3573_v27  ;;  %v566_v27 = vpack.c.bf16 %v466_v24, %v462_v23  ;;  %v525_v23 = vld [vmem:[%s4190_s9 + $0x380] sm:$0xff] }
  0xd0   : > { %v529_v24 = vld [vmem:[%s4190_s9 + $0x3a0] sm:$0xff] }
  0xd2   : > { %1026 = vmatpush1.bf16.msra.mxu0 %v3575_v28  ;;  %v3615_v28 = vld [vmem:[#allocation5 + $0x1a0] ss:$8 sps:$4 sm:$0xff]  }
  0xd3   : > { %1027 = vmatprep.subr.bf16.mxu0 %v3576_v29  ;;  %v3620_v29 = vld [vmem:[#allocation5 + $0x1b4] ss:$8 sps:$4 sm:$0xff]  }
  0xd6   : > { %1028 = vmatpush1.bf16.msra.mxu0 %v3578_v30  ;;  %v461_v30 = vld [vmem:[%s4190_s9 + $0x180] sm:$0xff] }
  0xd7   : > { %1029 = vmatprep.subr.bf16.mxu0 %v3579_v31  ;;  %v465_v31 = vld [vmem:[%s4190_s9 + $0x1a0] sm:$0xff] }
  0xd8   : > { %v565_v36 = vpack.c.bf16 %v465_v31, %v461_v30  ;;  %v537_v30 = vld [vmem:[%s4190_s9 + $0x3e0] sm:$0xff]  ;;  %v416_v31 = vld [vmem:[%s4190_s9 + $0x18] sm:$0xff] }
  0xda   : > { %1030 = vmatpush1.bf16.msra.mxu0 %v3581_v32  ;;  %v3618_v32 = vld [vmem:[#allocation5 + $0x1b0] ss:$8 sps:$4 sm:$0xff]  }
  0xdb   : > { %1031 = vmatprep.subr.bf16.mxu0 %v3582_v33  ;;  %v470_v33 = vld [vmem:[%s4190_s9 + $0x1c8] sm:$0xff] }
  0xde   : > { %1032 = vmatpush1.bf16.msra.mxu0 %v3584_v34  ;;  %v474_v34 = vld [vmem:[%s4190_s9 + $0x1e8] sm:$0xff] }
  0xdf   : > { %1194 = vmatprep.subr.bf16.mxu0 %v3587_v37  ;;  %v570_v37 = vpack.c.bf16 %v474_v34, %v470_v33 }
  0xe1   : > { %1034 = vmatmul.mubr.bf16.vlgmr.msra.gmra.mrb[0].mxu0 %v541_v40  ;;  %v469_v40 = vld [vmem:[%s4190_s9 + $0x1c0] sm:$0xff] }
  0xe2   : > { %1195 = vmatpush1.bf16.msra.mxu0 %v3585_v41  ;;  %1043 = vmatprep.mubr.bf16.mxu0 %v546_v42  ;;  %v473_v41 = vld [vmem:[%s4190_s9 + $0x1e0] sm:$0xff]  ;;  %v3624_v42 = vld [vmem:[#allocation5 + $0x1d0] ss:$8 sps:$4 sm:$0xff]  }
  0xe3   : > { %1196 = vmatprep.subr.bf16.mxu0 %v3590_v43  ;;  %v478_v43 = vld [vmem:[%s4190_s9 + $0x208] sm:$0xff] }
  0xe4   : > { %v574_v47 = vpack.c.bf16 %v482_v44, %v478_v43  ;;  %v3637_v44 = vld [vmem:[#allocation7 + $0x50] sm:$0xff]  }
  0xe6   : > { %1197 = vmatpush1.bf16.msra.mxu0 %v3588_v46  ;;  %v569_v46 = vpack.c.bf16 %v473_v41, %v469_v40  ;;  %v424_v40 = vld [vmem:[%s4190_s9 + $0x58] sm:$0xff] }
  0xe7   : > { %1198 = vmatprep.subr.bf16.mxu0 %v3593_v49  ;;  %v3632_v49 = vld [vmem:[#allocation5 + $0x1f4] ss:$8 sps:$4 sm:$0xff]  }
  0xe8   : > { %v428_v41 = vld [vmem:[%s4190_s9 + $0x78] sm:$0xff] }
  0xe9   : > { %1044 = vmatmul.mubr.bf16.gmra.mrb[4].mxu0 %v545_v51  ;;  %v481_v51 = vld [vmem:[%s4190_s9 + $0x220] sm:$0xff] }
  0xea   : > { %1053 = vmatprep.mubr.bf16.mxu0 %v550_v53  ;;  %1199 = vmatpush1.bf16.msra.mxu0 %v3591_v50  ;;  %v477_v50 = vld [vmem:[%s4190_s9 + $0x200] sm:$0xff]  ;;  %v486_v53 = vld [vmem:[%s4190_s9 + $0x248] sm:$0xff] }
  0xeb   : > { %1200 = vmatprep.subr.bf16.mxu0 %v3596_v52  ;;  %v3630_v52 = vld [vmem:[#allocation5 + $0x1f0] ss:$8 sps:$4 sm:$0xff]   ;;  %v573_v55 = vpack.c.bf16 %v481_v51, %v477_v50  ;;  %v578_v56 = vpack.c.bf16 %v490_v54, %v486_v53  ;;  %v3641_v54 = vld [vmem:[#allocation7 + $0x60] sm:$0xff]  }
  0xec   : > { %v432_v50 = vld [vmem:[%s4190_s9 + $0x98] sm:$0xff] }
  0xed   : > { %v436_v51 = vld [vmem:[%s4190_s9 + $0xb8] sm:$0xff] }
  0xee   : > { %1201 = vmatpush1.bf16.msra.mxu0 %v3594_v58  ;;  %v489_v58 = vld [vmem:[%s4190_s9 + $0x260] sm:$0xff] }
  0xef   : > { %1202 = vmatprep.subr.bf16.mxu0 %v3599_v59  ;;  %v494_v59 = vld [vmem:[%s4190_s9 + $0x288] sm:$0xff] }
  0xf1   : > { %1054 = vmatmul.mubr.bf16.gmra.mrb[8].mxu0 %v549_v61  ;;  %v577_v61 = vpack.c.bf16 %v489_v58, %v485_v57  ;;  %v3643_v57 = vld [vmem:[#allocation7 + $0x68] sm:$0xff]   ;;  %v431_v58 = vld [vmem:[%s4190_s9 + $0x90] sm:$0xff] }
  0xf2   : > { %1063 = vmatprep.mubr.bf16.mxu0 %v554_v63  ;;  %1203 = vmatpush1.bf16.msra.mxu0 %v3597_v60  ;;  %v498_v60 = vld [vmem:[%s4190_s9 + $0x2a8] sm:$0xff]  ;;  %v493_v63 = vld [vmem:[%s4190_s9 + $0x280] sm:$0xff] }
  0xf3   : > { %1204 = vmatprep.subr.bf16.mxu0 %v3602_v62  ;;  %v582_v62 = vpack.c.bf16 %v498_v60, %v494_v59  ;;  %v581_v3 = vpack.c.bf16 %v497_v0, %v493_v63  ;;  %v435_v59 = vld [vmem:[%s4190_s9 + $0xb0] sm:$0xff]  ;;  %v440_v60 = vld [vmem:[%s4190_s9 + $0xd8] sm:$0xff] }
  0xf4   : > { %v439_v0 = vld [vmem:[%s4190_s9 + $0xd0] sm:$0xff] }
  0xf6   : > { %1205 = vmatpush1.bf16.msra.mxu0 %v3600_v4  ;;  %v586_v4 = vpack.c.bf16 %v506_v2, %v502_v1  ;;  %v443_v1 = vld [vmem:[%s4190_s9 + $0xf0] sm:$0xff]  ;;  %v448_v2 = vld [vmem:[%s4190_s9 + $0x118] sm:$0xff] }
  0xf7   : > { %1206 = vmatprep.subr.bf16.mxu0 %v3605_v5  ;;  %v501_v5 = vld [vmem:[%s4190_s9 + $0x2c0] sm:$0xff] }
  0xf9   : > { %1064 = vmatmul.mubr.bf16.gmra.mrb[12].mxu0 %v553_v7  ;;  %v510_v7 = vld [vmem:[%s4190_s9 + $0x308] sm:$0xff] }
  0xfa   : > { %1073 = vmatprep.mubr.bf16.mxu0 %v558_v9  ;;  %1207 = vmatpush1.bf16.msra.mxu0 %v3603_v6  ;;  %v505_v6 = vld [vmem:[%s4190_s9 + $0x2e0] sm:$0xff] }
  0xfb   : > { %1208 = vmatprep.subr.bf16.mxu0 %v3608_v8  ;;  %v514_v8 = vld [vmem:[%s4190_s9 + $0x328] sm:$0xff]  ;;  %v585_v9 = vpack.c.bf16 %v505_v6, %v501_v5  ;;  %v447_v6 = vld [vmem:[%s4190_s9 + $0x110] sm:$0xff] }
  0xfc   : > { %v590_v10 = vpack.c.bf16 %v514_v8, %v510_v7  ;;  %v451_v7 = vld [vmem:[%s4190_s9 + $0x130] sm:$0xff]  ;;  %v456_v8 = vld [vmem:[%s4190_s9 + $0x158] sm:$0xff] }
  0xfe   : > { %1209 = vmatpush1.bf16.msra.mxu0 %v3606_v14  ;;  %v522_v14 = vld [vmem:[%s4190_s9 + $0x368] sm:$0xff] }
  0xff   : > { %1210 = vmatprep.subr.bf16.mxu0 %v3611_v15  ;;  %v589_v15 = vpack.c.bf16 %v513_v12, %v509_v11  ;;  %v455_v12 = vld [vmem:[%s4190_s9 + $0x150] sm:$0xff] }
 0x101   : > { %1074 = vmatmul.mubr.bf16.gmra.mrb[16].mxu0 %v557_v17  ;;  %v517_v17 = vld [vmem:[%s4190_s9 + $0x340] sm:$0xff] }
 0x102   : > { %1083 = vmatprep.mubr.bf16.mxu0 %v562_v19  ;;  %1211 = vmatpush1.bf16.msra.mxu0 %v3609_v16  ;;  %v594_v16 = vpack.c.bf16 %v522_v14, %v518_v13  ;;  %v526_v19 = vld [vmem:[%s4190_s9 + $0x388] sm:$0xff]  ;;  %v459_v13 = vld [vmem:[%s4190_s9 + $0x170] sm:$0xff]  ;;  %v464_v14 = vld [vmem:[%s4190_s9 + $0x198] sm:$0xff] }
 0x103   : > { %1212 = vmatprep.subr.bf16.mxu0 %v3614_v18  ;;  %v521_v18 = vld [vmem:[%s4190_s9 + $0x360] sm:$0xff] }
 0x104   : > { %v593_v21 = vpack.c.bf16 %v521_v18, %v517_v17  ;;  %v463_v18 = vld [vmem:[%s4190_s9 + $0x190] sm:$0xff] }
 0x106   : > { %1213 = vmatpush1.bf16.msra.mxu0 %v3612_v22  ;;  %v598_v22 = vpack.c.bf16 %v530_v20, %v526_v19  ;;  %v467_v19 = vld [vmem:[%s4190_s9 + $0x1b0] sm:$0xff]  ;;  %v472_v20 = vld [vmem:[%s4190_s9 + $0x1d8] sm:$0xff] }
 0x107   : > { %1214 = vmatprep.subr.bf16.mxu0 %v3617_v25  ;;  %v534_v25 = vld [vmem:[%s4190_s9 + $0x3c8] sm:$0xff] }
 0x109   : > { %1084 = vmatmul.mubr.bf16.gmra.mrb[20].mxu0 %v561_v26  ;;  %v538_v26 = vld [vmem:[%s4190_s9 + $0x3e8] sm:$0xff] }
 0x10a   : > { %1093 = vmatprep.mubr.bf16.mxu0 %v566_v27  ;;  %1215 = vmatpush1.bf16.msra.mxu0 %v3615_v28  ;;  %v597_v27 = vpack.c.bf16 %v529_v24, %v525_v23  ;;  %v602_v28 = vpack.c.bf16 %v538_v26, %v534_v25  ;;  %v471_v24 = vld [vmem:[%s4190_s9 + $0x1d0] sm:$0xff]  ;;  %v480_v26 = vld [vmem:[%s4190_s9 + $0x218] sm:$0xff] }
 0x10b   : > { %1216 = vmatprep.subr.bf16.mxu0 %v3620_v29  ;;  %v533_v29 = vld [vmem:[%s4190_s9 + $0x3c0] sm:$0xff]  ;;  %v475_v25 = vld [vmem:[%s4190_s9 + $0x1f0] sm:$0xff] }
 0x10c   : > { %v601_v33 = vpack.c.bf16 %v537_v30, %v533_v29  ;;  %v479_v30 = vld [vmem:[%s4190_s9 + $0x210] sm:$0xff] }
 0x10e   : > { %1217 = vmatpush1.bf16.msra.mxu0 %v3618_v32  ;;  %v420_v32 = vld [vmem:[%s4190_s9 + $0x38] sm:$0xff] }
 0x10f   : > { %1218 = vmatprep.subr.bf16.mxu0 %v3623_v35  ;;  %v544_v34 = vpack.c.bf16 %v420_v32, %v416_v31  ;;  %v3633_v35 = vld [vmem:[#allocation7 + $0x40] sm:$0xff]   ;;  %v483_v31 = vld [vmem:[%s4190_s9 + $0x230] sm:$0xff]  ;;  %v488_v32 = vld [vmem:[%s4190_s9 + $0x258] sm:$0xff] }
 0x110   : > { %3111 = vmatprep.subr.bf16.mxu1 %v3633_v35 }
 0x111   : > { %1094 = vmatmul.mubr.bf16.gmra.mrb[24].mxu0 %v565_v36  ;;  %v3634_v36 = vld [vmem:[#allocation7] sm:$0xff]  }
 0x112   : > { %1103 = vmatprep.mubr.bf16.mxu0 %v570_v37  ;;  %1219 = vmatpush1.bf16.msra.mxu0 %v3621_v38  ;;  %v3635_v37 = vld [vmem:[#allocation7 + $0x48] sm:$0xff]   ;;  %v415_v38 = vld [vmem:[%s4190_s9 + $0x10] sm:$0xff] }
 0x113   : > { %1220 = vmatprep.subr.bf16.mxu0 %v3626_v39  ;;  %v419_v39 = vld [vmem:[%s4190_s9 + $0x30] sm:$0xff]  ;;  %3112 = vmatpush3.bf16.msra.mxu1 %v3634_v36 }
 0x114   : > { %v543_v43 = vpack.c.bf16 %v419_v39, %v415_v38  ;;  %3113 = vmatprep.subr.bf16.mxu1 %v3635_v37  ;;  %v487_v36 = vld [vmem:[%s4190_s9 + $0x250] sm:$0xff]  ;;  %v496_v38 = vld [vmem:[%s4190_s9 + $0x298] sm:$0xff] }
 0x115   : > { %v491_v37 = vld [vmem:[%s4190_s9 + $0x270] sm:$0xff]  ;;  %v500_v39 = vld [vmem:[%s4190_s9 + $0x2b8] sm:$0xff] }
 0x116   : > { %1221 = vmatpush1.bf16.msra.mxu0 %v3624_v42  ;;  %v3636_v42 = vld [vmem:[#allocation7 + $0x8] sm:$0xff]  }
 0x117   : > { %1222 = vmatprep.subr.bf16.mxu0 %v3629_v45  ;;  %v548_v45 = vpack.c.bf16 %v428_v41, %v424_v40  ;;  %3114 = vmatpush3.bf16.msra.mxu1 %v3636_v42  ;;  %v579_v40 = vpack.c.bf16 %v491_v37, %v487_v36  ;;  %v584_v41 = vpack.c.bf16 %v500_v39, %v496_v38  ;;  %v495_v42 = vld [vmem:[%s4190_s9 + $0x290] sm:$0xff] }
 0x118   : > { %3115 = vmatprep.subr.bf16.mxu1 %v3637_v44  ;;  %v504_v44 = vld [vmem:[%s4190_s9 + $0x2d8] sm:$0xff] }
 0x119   : > { %1104 = vmatmul.mubr.bf16.gmra.mrb[28].mxu0 %v569_v46  ;;  %v3638_v46 = vld [vmem:[#allocation7 + $0x10] sm:$0xff]  }
 0x11a   : > { %1113 = vmatprep.mubr.bf16.mxu0 %v574_v47  ;;  %1223 = vmatpush1.bf16.msra.mxu0 %v3627_v48  ;;  %v3639_v47 = vld [vmem:[#allocation7 + $0x58] sm:$0xff]   ;;  %v423_v48 = vld [vmem:[%s4190_s9 + $0x50] sm:$0xff] }
 0x11b   : > { %1224 = vmatprep.subr.bf16.mxu0 %v3632_v49  ;;  %v427_v49 = vld [vmem:[%s4190_s9 + $0x70] sm:$0xff]  ;;  %3116 = vmatpush3.bf16.msra.mxu1 %v3638_v46 }
 0x11c   : > { %v547_v53 = vpack.c.bf16 %v427_v49, %v423_v48  ;;  %3117 = vmatprep.subr.bf16.mxu1 %v3639_v47  ;;  %v503_v48 = vld [vmem:[%s4190_s9 + $0x2d0] sm:$0xff] }
 0x11d   : > { %v507_v49 = vld [vmem:[%s4190_s9 + $0x2f0] sm:$0xff] }
 0x11e   : > { %1225 = vmatpush1.bf16.msra.mxu0 %v3630_v52  ;;  %v3640_v52 = vld [vmem:[#allocation7 + $0x18] sm:$0xff]  }
 0x11f   : > { %3118 = vmatpush3.bf16.msra.mxu1 %v3640_v52  ;;  %v516_v52 = vld [vmem:[%s4190_s9 + $0x338] sm:$0xff] }
 0x120   : > { %3119 = vmatprep.subr.bf16.mxu1 %v3641_v54  ;;  %v3645_v54 = vld [vmem:[#allocation7 + $0x70] sm:$0xff]  }
 0x121   : > { %1114 = vmatmul.mubr.bf16.gmra.mrb[32].mxu0 %v573_v55  ;;  %v552_v55 = vpack.c.bf16 %v436_v51, %v432_v50  ;;  %v3644_v50 = vld [vmem:[#allocation7 + $0x28] sm:$0xff]   ;;  %v512_v51 = vld [vmem:[%s4190_s9 + $0x318] sm:$0xff] }
 0x122   : > { %1123 = vmatprep.mubr.bf16.mxu0 %v578_v56  ;;  %v3642_v56 = vld [vmem:[#allocation7 + $0x20] sm:$0xff]  }
 0x123   : > { %3120 = vmatpush3.bf16.msra.mxu1 %v3642_v56  ;;  %v3646_v56 = vld [vmem:[#allocation7 + $0x30] sm:$0xff]  }
 0x124   : > { %3121 = vmatprep.subr.bf16.mxu1 %v3643_v57  ;;  %v3647_v57 = vld [vmem:[#allocation7 + $0x78] sm:$0xff]  }
 0x127   : > { %3122 = vmatpush3.bf16.msra.mxu1 %v3644_v50 }
 0x128   : > { %3123 = vmatprep.subr.bf16.mxu1 %v3645_v54 }
 0x129   : > { %1124 = vmatmul.mubr.bf16.gmra.mrb[36].mxu0 %v577_v61  ;;  %v444_v61 = vld [vmem:[%s4190_s9 + $0xf8] sm:$0xff] }
 0x12a   : > { %1133 = vmatprep.mubr.bf16.mxu0 %v582_v62  ;;  %v551_v62 = vpack.c.bf16 %v435_v59, %v431_v58  ;;  %v556_v63 = vpack.c.bf16 %v444_v61, %v440_v60  ;;  %v511_v58 = vld [vmem:[%s4190_s9 + $0x310] sm:$0xff]  ;;  %v3648_v60 = vld [vmem:[#allocation7 + $0x38] sm:$0xff]  }
 0x12b   : > { %3124 = vmatpush3.bf16.msra.mxu1 %v3646_v56  ;;  %v515_v59 = vld [vmem:[%s4190_s9 + $0x330] sm:$0xff]  ;;  %v520_v61 = vld [vmem:[%s4190_s9 + $0x358] sm:$0xff] }
 0x12c   : > { %3125 = vmatprep.subr.bf16.mxu1 %v3647_v57  ;;  %v3652_v57 = vld [vmem:[#allocation8 + $0x18] sm:$0xff]  }
 0x12f   : > { %3126 = vmatpush3.bf16.msra.mxu1 %v3648_v60 }
 0x131   : > { %1134 = vmatmul.mubr.bf16.gmra.mrb[40].mxu0 %v581_v3  ;;  %v452_v3 = vld [vmem:[%s4190_s9 + $0x138] sm:$0xff] }
 0x132   : > { %1143 = vmatprep.mubr.bf16.mxu0 %v586_v4  ;;  %v555_v4 = vpack.c.bf16 %v443_v1, %v439_v0  ;;  %v560_v5 = vpack.c.bf16 %v452_v3, %v448_v2  ;;  %v519_v1 = vld [vmem:[%s4190_s9 + $0x350] sm:$0xff]  ;;  %v528_v3 = vld [vmem:[%s4190_s9 + $0x398] sm:$0xff] }
 0x133   : > { %v523_v2 = vld [vmem:[%s4190_s9 + $0x370] sm:$0xff] }
 0x139   : > { %1144 = vmatmul.mubr.bf16.gmra.mrb[44].mxu0 %v585_v9  ;;  %v460_v9 = vld [vmem:[%s4190_s9 + $0x178] sm:$0xff] }
 0x13a   : > { %1153 = vmatprep.mubr.bf16.mxu0 %v590_v10  ;;  %v559_v10 = vpack.c.bf16 %v451_v7, %v447_v6  ;;  %v564_v11 = vpack.c.bf16 %v460_v9, %v456_v8  ;;  %v527_v7 = vld [vmem:[%s4190_s9 + $0x390] sm:$0xff]  ;;  %v536_v9 = vld [vmem:[%s4190_s9 + $0x3d8] sm:$0xff] }
 0x13b   : > { %v531_v8 = vld [vmem:[%s4190_s9 + $0x3b0] sm:$0xff] }
 0x141   : > { %1154 = vmatmul.mubr.bf16.gmra.mrb[48].mxu0 %v589_v15  ;;  %v468_v15 = vld [vmem:[%s4190_s9 + $0x1b8] sm:$0xff] }
 0x142   : > { %1163 = vmatprep.mubr.bf16.mxu0 %v594_v16  ;;  %v563_v16 = vpack.c.bf16 %v459_v13, %v455_v12  ;;  %v568_v17 = vpack.c.bf16 %v468_v15, %v464_v14  ;;  %v535_v13 = vld [vmem:[%s4190_s9 + $0x3d0] sm:$0xff] }
 0x143   : > { %v539_v14 = vld [vmem:[%s4190_s9 + $0x3f0] sm:$0xff] }
 0x144   : > { %v603_v15 = vpack.c.bf16 %v539_v14, %v535_v13 }
 0x149   : > { %1164 = vmatmul.mubr.bf16.gmra.mrb[52].mxu0 %v593_v21  ;;  %v476_v21 = vld [vmem:[%s4190_s9 + $0x1f8] sm:$0xff] }
 0x14a   : > { %1173 = vmatprep.mubr.bf16.mxu0 %v598_v22  ;;  %v567_v22 = vpack.c.bf16 %v467_v19, %v463_v18  ;;  %v572_v23 = vpack.c.bf16 %v476_v21, %v472_v20  ;;  %v3649_v18 = vld [vmem:[#allocation8] sm:$0xff]  }
 0x14b   : > { %3247 = vmatprep.subr.bf16.mxu1 %v3649_v18  ;;  %v669_v20 = vld [vmem:[%s4911_s2] sm:$0x3] }
 0x151   : > { %1174 = vmatmul.mubr.bf16.gmra.mrb[56].mxu0 %v597_v27  ;;  %v484_v27 = vld [vmem:[%s4190_s9 + $0x238] sm:$0xff] }
 0x152   : > { %1183 = vmatprep.mubr.bf16.mxu0 %v602_v28  ;;  %v571_v28 = vpack.c.bf16 %v475_v25, %v471_v24  ;;  %v576_v29 = vpack.c.bf16 %v484_v27, %v480_v26 }
 0x159   : > { %1184 = vmatmul.mubr.bf16.gmra.mrb[60].mxu0 %v601_v33  ;;  %v492_v33 = vld [vmem:[%s4190_s9 + $0x278] sm:$0xff] }
 0x15a   : > { %1226 = vmatprep.mubr.bf16.mxu0 %v544_v34  ;;  %v575_v34 = vpack.c.bf16 %v483_v31, %v479_v30  ;;  %v580_v35 = vpack.c.bf16 %v492_v33, %v488_v32 }
 0x161   : > { %1227 = vmatmul.mubr.bf16.vlgmr.msra.gmra.mrb[0].mxu0 %v543_v43  ;;  %v499_v43 = vld [vmem:[%s4190_s9 + $0x2b0] sm:$0xff] }
 0x162   : > { %1236 = vmatprep.mubr.bf16.mxu0 %v548_v45  ;;  %v508_v45 = vld [vmem:[%s4190_s9 + $0x2f8] sm:$0xff]  ;;  %v583_v46 = vpack.c.bf16 %v499_v43, %v495_v42 }
 0x163   : > { %v588_v47 = vpack.c.bf16 %v508_v45, %v504_v44 }
 0x169   : > { %1237 = vmatmul.mubr.bf16.gmra.mrb[4].mxu0 %v547_v53  ;;  %v587_v53 = vpack.c.bf16 %v507_v49, %v503_v48  ;;  %v3651_v49 = vld [vmem:[#allocation8 + $0x10] sm:$0xff]  }
 0x16a   : > { %1246 = vmatprep.mubr.bf16.mxu0 %v552_v55  ;;  %v592_v55 = vpack.c.bf16 %v516_v52, %v512_v51 }
 0x171   : > { %1247 = vmatmul.mubr.bf16.gmra.mrb[8].mxu0 %v551_v62  ;;  %v524_v62 = vld [vmem:[%s4190_s9 + $0x378] sm:$0xff] }
 0x172   : > { %1256 = vmatprep.mubr.bf16.mxu0 %v556_v63  ;;  %v591_v63 = vpack.c.bf16 %v515_v59, %v511_v58  ;;  %v596_v0 = vpack.c.bf16 %v524_v62, %v520_v61 }
 0x179   : > { %1257 = vmatmul.mubr.bf16.gmra.mrb[12].mxu0 %v555_v4  ;;  %v532_v4 = vld [vmem:[%s4190_s9 + $0x3b8] sm:$0xff] }
 0x17a   : > { %1266 = vmatprep.mubr.bf16.mxu0 %v560_v5  ;;  %v595_v5 = vpack.c.bf16 %v523_v2, %v519_v1  ;;  %v600_v6 = vpack.c.bf16 %v532_v4, %v528_v3  ;;  %v3653_v1 = vld [vmem:[#allocation8 + $0x20] sm:$0xff]  }
 0x181   : > { %1267 = vmatmul.mubr.bf16.gmra.mrb[16].mxu0 %v559_v10  ;;  %v540_v10 = vld [vmem:[%s4190_s9 + $0x3f8] sm:$0xff]  ;;  %s4944_s9 = sld [smem:[#allocation19_spill]] }
 0x182   : > { %1276 = vmatprep.mubr.bf16.mxu0 %v564_v11  ;;  %v599_v11 = vpack.c.bf16 %v531_v8, %v527_v7  ;;  %v604_v12 = vpack.c.bf16 %v540_v10, %v536_v9  ;;  %v3654_v9 = vld [vmem:[#allocation8 + $0x28] sm:$0xff]  }
 0x187   : > { %s4859_s15 = scalar_lea.hbm %s4944_s9, %s3110_s21 }
 0x189   : > { %1277 = vmatmul.mubr.bf16.gmra.mrb[20].mxu0 %v563_v16  ;;  %v671_v16 = vlaneseq }
 0x18a   : > { %1286 = vmatprep.mubr.bf16.mxu0 %v568_v17 }
 0x18b   : > { %v4332_v17 = vshrl.u32 %v671_v16, 7 }
 0x18d   : > { %v673_v19 = vsub.s32 0, %v4332_v17  ;;  %v677_v21 = vsub.s32 1, %v4332_v17 }
 0x191   : > { %1287 = vmatmul.mubr.bf16.gmra.mrb[24].mxu0 %v567_v22  ;;  %v4341_v22 = vrot.slane %v669_v20, %v673_v19 }
 0x192   : > { %1296 = vmatprep.mubr.bf16.mxu0 %v572_v23  ;;  %v4345_v23 = vrot.slane %v669_v20, %v677_v21 }
 0x199   : > { %1297 = vmatmul.mubr.bf16.gmra.mrb[28].mxu0 %v571_v28 }
 0x19a   : > { %1306 = vmatprep.mubr.bf16.mxu0 %v576_v29 }
 0x1a1   : > { %1307 = vmatmul.mubr.bf16.gmra.mrb[32].mxu0 %v575_v34 }
 0x1a2   : > { %1316 = vmatprep.mubr.bf16.mxu0 %v580_v35 }
 0x1a9   : > { %1317 = vmatmul.mubr.bf16.gmra.mrb[36].mxu0 %v579_v40 }
 0x1aa   : > { %1326 = vmatprep.mubr.bf16.mxu0 %v584_v41  ;;  %v3650_v41 = vld [vmem:[#allocation8 + $0x8] sm:$0xff]  }
 0x1b1   : > { %1327 = vmatmul.mubr.bf16.gmra.mrb[40].mxu0 %v583_v46 }
 0x1b2   : > { %1336 = vmatprep.mubr.bf16.mxu0 %v588_v47 }
 0x1b9   : > { %1337 = vmatmul.mubr.bf16.gmra.mrb[44].mxu0 %v587_v53 }
 0x1ba   : > { %1346 = vmatprep.mubr.bf16.mxu0 %v592_v55 }
 0x1c1   : > { %1347 = vmatmul.mubr.bf16.gmra.mrb[48].mxu0 %v591_v63 }
 0x1c2   : > { %1356 = vmatprep.mubr.bf16.mxu0 %v596_v0 }
 0x1c9   : > { %1357 = vmatmul.mubr.bf16.gmra.mrb[52].mxu0 %v595_v5 }
 0x1ca   : > { %1366 = vmatprep.mubr.bf16.mxu0 %v600_v6 }
 0x1d1   : > { %1367 = vmatmul.mubr.bf16.gmra.mrb[56].mxu0 %v599_v11 }
 0x1d2   : > { %1376 = vmatprep.mubr.bf16.mxu0 %v604_v12 }
 0x1d9   : > { %1377 = vmatmul.mubr.bf16.gmra.mrb[60].mxu0 %v603_v15 }
 0x234   : > { %v1228_v24 = vpop.f32.mrb[0].mxu0 }
 0x235   : > { %v3311_v25 = vadd.f32 %v1228_v24, %v4341_v22  ;;  %v1230_v26 = vpop.f32.mrb[1].mxu0 }
 0x236   : > { %v3312_v27 = vadd.f32 %v1230_v26, %v4345_v23  ;;  %v1232_v28 = vpop.f32.mrb[2].mxu0 }
 0x237   : > { %v3313_v29 = vadd.f32 %v1232_v28, %v4341_v22  ;;  %v1234_v30 = vpop.f32.mrb[3].mxu0  ;;  %v1387_v32 = vmax.f32 %v3311_v25, 0.0 }
 0x238   : > { %v3314_v31 = vadd.f32 %v1234_v30, %v4345_v23  ;;  %v1388_v34 = vmax.f32 %v3312_v27, 0.0 }
 0x239   : > { %v1389_v33 = vmax.f32 %v3313_v29, 0.0 }
 0x23a   : > { %v1390_v35 = vmax.f32 %v3314_v31, 0.0 }
 0x23b   : > { %v1451_v36 = vpack.c.bf16 %v1389_v33, %v1387_v32 }
 0x23c   : > { %v1238_v37 = vpop.f32.mrb[4].mxu0  ;;  %v1452_v38 = vpack.c.bf16 %v1390_v35, %v1388_v34 }
 0x23d   : > { %v3315_v39 = vadd.f32 %v1238_v37, %v4341_v22  ;;  %v1240_v40 = vpop.f32.mrb[5].mxu0 }
 0x23e   : > { %v3316_v42 = vadd.f32 %v1240_v40, %v4345_v23  ;;  %v1242_v43 = vpop.f32.mrb[6].mxu0  ;;  %1650 = vmatprep.mubr.bf16.mxu1 %v1452_v38 }
 0x23f   : > { %v3317_v44 = vadd.f32 %v1242_v43, %v4341_v22  ;;  %v1244_v45 = vpop.f32.mrb[7].mxu0  ;;  %1651 = vmatmul.mubr.bf16.vlgmr.msra.gmra.mrb[0].mxu1 %v1451_v36  ;;  %v1391_v47 = vmax.f32 %v3315_v39, 0.0 }
 0x240   : > { %v3318_v46 = vadd.f32 %v1244_v45, %v4345_v23  ;;  %3248 = vmatpush3.bf16.msra.mxu1 %v3649_v18  ;;  %v1392_v50 = vmax.f32 %v3316_v42, 0.0  ;;  %v3655_v18 = vld [vmem:[#allocation8 + $0x30] sm:$0xff]  }
 0x241   : > { %v1393_v48 = vmax.f32 %v3317_v44, 0.0  ;;  %3249 = vmatprep.subr.bf16.mxu1 %v3650_v41 }
 0x242   : > { %v1394_v51 = vmax.f32 %v3318_v46, 0.0 }
 0x243   : > { %v1453_v52 = vpack.c.bf16 %v1393_v48, %v1391_v47 }
 0x244   : > { %v1454_v53 = vpack.c.bf16 %v1394_v51, %v1392_v50  ;;  %v1248_v54 = vpop.f32.mrb[8].mxu0  ;;  %3250 = vmatpush3.bf16.msra.mxu1 %v3650_v41 }
 0x245   : > { %v3319_v55 = vadd.f32 %v1248_v54, %v4341_v22  ;;  %v1250_v56 = vpop.f32.mrb[9].mxu0  ;;  %3251 = vmatprep.subr.bf16.mxu1 %v3651_v49 }
 0x246   : > { %v3320_v58 = vadd.f32 %v1250_v56, %v4345_v23  ;;  %v1252_v59 = vpop.f32.mrb[10].mxu0  ;;  %1658 = vmatprep.mubr.bf16.mxu1 %v1454_v53 }
 0x247   : > { %v3321_v60 = vadd.f32 %v1252_v59, %v4341_v22  ;;  %v1254_v61 = vpop.f32.mrb[11].mxu0  ;;  %1659 = vmatmul.mubr.bf16.gmra.mrb[4].mxu1 %v1453_v52  ;;  %v1395_v63 = vmax.f32 %v3319_v55, 0.0 }
 0x248   : > { %v3322_v62 = vadd.f32 %v1254_v61, %v4345_v23  ;;  %3252 = vmatpush3.bf16.msra.mxu1 %v3651_v49  ;;  %v1396_v2 = vmax.f32 %v3320_v58, 0.0 }
 0x249   : > { %v1397_v0 = vmax.f32 %v3321_v60, 0.0  ;;  %3253 = vmatprep.subr.bf16.mxu1 %v3652_v57 }
 0x24a   : > { %v1398_v3 = vmax.f32 %v3322_v62, 0.0 }
 0x24b   : > { %v1455_v4 = vpack.c.bf16 %v1397_v0, %v1395_v63 }
 0x24c   : > { %v1456_v5 = vpack.c.bf16 %v1398_v3, %v1396_v2  ;;  %v1258_v6 = vpop.f32.mrb[12].mxu0  ;;  %3254 = vmatpush3.bf16.msra.mxu1 %v3652_v57 }
 0x24d   : > { %v3323_v7 = vadd.f32 %v1258_v6, %v4341_v22  ;;  %v1260_v8 = vpop.f32.mrb[13].mxu0  ;;  %3255 = vmatprep.subr.bf16.mxu1 %v3653_v1 }
 0x24e   : > { %v3324_v10 = vadd.f32 %v1260_v8, %v4345_v23  ;;  %v1262_v11 = vpop.f32.mrb[14].mxu0  ;;  %1666 = vmatprep.mubr.bf16.mxu1 %v1456_v5 }
 0x24f   : > { %v3325_v12 = vadd.f32 %v1262_v11, %v4341_v22  ;;  %v1264_v13 = vpop.f32.mrb[15].mxu0  ;;  %1667 = vmatmul.mubr.bf16.gmra.mrb[8].mxu1 %v1455_v4  ;;  %v1399_v15 = vmax.f32 %v3323_v7, 0.0 }
 0x250   : > { %v3326_v14 = vadd.f32 %v1264_v13, %v4345_v23  ;;  %3256 = vmatpush3.bf16.msra.mxu1 %v3653_v1  ;;  %v1400_v20 = vmax.f32 %v3324_v10, 0.0 }
 0x251   : > { %v1401_v16 = vmax.f32 %v3325_v12, 0.0  ;;  %3257 = vmatprep.subr.bf16.mxu1 %v3654_v9 }
 0x252   : > { %v1402_v24 = vmax.f32 %v3326_v14, 0.0 }
 0x253   : > { %v1457_v25 = vpack.c.bf16 %v1401_v16, %v1399_v15 }
 0x254   : > { %v1458_v26 = vpack.c.bf16 %v1402_v24, %v1400_v20  ;;  %v1268_v27 = vpop.f32.mrb[16].mxu0  ;;  %3258 = vmatpush3.bf16.msra.mxu1 %v3654_v9 }
 0x255   : > { %v3327_v28 = vadd.f32 %v1268_v27, %v4341_v22  ;;  %v1270_v29 = vpop.f32.mrb[17].mxu0  ;;  %3259 = vmatprep.subr.bf16.mxu1 %v3655_v18 }
 0x256   : > { %v3328_v30 = vadd.f32 %v1270_v29, %v4345_v23  ;;  %v1272_v31 = vpop.f32.mrb[18].mxu0  ;;  %1674 = vmatprep.mubr.bf16.mxu1 %v1458_v26 }
 0x257   : > { %v3329_v32 = vadd.f32 %v1272_v31, %v4341_v22  ;;  %v1274_v33 = vpop.f32.mrb[19].mxu0  ;;  %1675 = vmatmul.mubr.bf16.gmra.mrb[12].mxu1 %v1457_v25  ;;  %v1403_v35 = vmax.f32 %v3327_v28, 0.0 }
 0x258   : > { %v3330_v34 = vadd.f32 %v1274_v33, %v4345_v23  ;;  %3260 = vmatpush3.bf16.msra.mxu1 %v3655_v18  ;;  %v1404_v37 = vmax.f32 %v3328_v30, 0.0 }
 0x259   : > { %v1405_v36 = vmax.f32 %v3329_v32, 0.0 }
 0x25a   : > { %v1406_v38 = vmax.f32 %v3330_v34, 0.0 }
 0x25b   : > { %v1459_v39 = vpack.c.bf16 %v1405_v36, %v1403_v35 }
 0x25c   : > { %v1460_v40 = vpack.c.bf16 %v1406_v38, %v1404_v37  ;;  %v1278_v41 = vpop.f32.mrb[20].mxu0 }
 0x25d   : > { %v3331_v42 = vadd.f32 %v1278_v41, %v4341_v22  ;;  %v1280_v43 = vpop.f32.mrb[21].mxu0 }
 0x25e   : > { %v3332_v44 = vadd.f32 %v1280_v43, %v4345_v23  ;;  %v1282_v45 = vpop.f32.mrb[22].mxu0  ;;  %1682 = vmatprep.mubr.bf16.mxu1 %v1460_v40 }
 0x25f   : > { %v3333_v46 = vadd.f32 %v1282_v45, %v4341_v22  ;;  %v1284_v47 = vpop.f32.mrb[23].mxu0  ;;  %1683 = vmatmul.mubr.bf16.gmra.mrb[16].mxu1 %v1459_v39  ;;  %v1407_v49 = vmax.f32 %v3331_v42, 0.0 }
 0x260   : > { %v3334_v48 = vadd.f32 %v1284_v47, %v4345_v23  ;;  %v1408_v51 = vmax.f32 %v3332_v44, 0.0 }
 0x261   : > { %v1409_v50 = vmax.f32 %v3333_v46, 0.0 }
 0x262   : > { %v1410_v52 = vmax.f32 %v3334_v48, 0.0 }
 0x263   : > { %v1461_v53 = vpack.c.bf16 %v1409_v50, %v1407_v49 }
 0x264   : > { %v1462_v54 = vpack.c.bf16 %v1410_v52, %v1408_v51  ;;  %v1288_v55 = vpop.f32.mrb[24].mxu0 }
 0x265   : > { %v3335_v56 = vadd.f32 %v1288_v55, %v4341_v22  ;;  %v1290_v57 = vpop.f32.mrb[25].mxu0 }
 0x266   : > { %v3336_v58 = vadd.f32 %v1290_v57, %v4345_v23  ;;  %v1292_v59 = vpop.f32.mrb[26].mxu0  ;;  %1690 = vmatprep.mubr.bf16.mxu1 %v1462_v54 }
 0x267   : > { %v3337_v60 = vadd.f32 %v1292_v59, %v4341_v22  ;;  %v1294_v61 = vpop.f32.mrb[27].mxu0  ;;  %1691 = vmatmul.mubr.bf16.gmra.mrb[20].mxu1 %v1461_v53  ;;  %v1411_v63 = vmax.f32 %v3335_v56, 0.0 }
 0x268   : > { %v3338_v62 = vadd.f32 %v1294_v61, %v4345_v23  ;;  %v1412_v1 = vmax.f32 %v3336_v58, 0.0 }
 0x269   : > { %v1413_v0 = vmax.f32 %v3337_v60, 0.0 }
 0x26a   : > { %v1414_v2 = vmax.f32 %v3338_v62, 0.0 }
 0x26b   : > { %v1463_v3 = vpack.c.bf16 %v1413_v0, %v1411_v63 }
 0x26c   : > { %v1464_v4 = vpack.c.bf16 %v1414_v2, %v1412_v1  ;;  %v1298_v5 = vpop.f32.mrb[28].mxu0 }
 0x26d   : > { %v3339_v6 = vadd.f32 %v1298_v5, %v4341_v22  ;;  %v1300_v7 = vpop.f32.mrb[29].mxu0 }
 0x26e   : > { %v3340_v8 = vadd.f32 %v1300_v7, %v4345_v23  ;;  %v1302_v9 = vpop.f32.mrb[30].mxu0  ;;  %1698 = vmatprep.mubr.bf16.mxu1 %v1464_v4 }
 0x26f   : > { %v3341_v10 = vadd.f32 %v1302_v9, %v4341_v22  ;;  %v1304_v11 = vpop.f32.mrb[31].mxu0  ;;  %1699 = vmatmul.mubr.bf16.gmra.mrb[24].mxu1 %v1463_v3  ;;  %v1415_v13 = vmax.f32 %v3339_v6, 0.0 }
 0x270   : > { %v3342_v12 = vadd.f32 %v1304_v11, %v4345_v23  ;;  %v1416_v15 = vmax.f32 %v3340_v8, 0.0 }
 0x271   : > { %v1417_v14 = vmax.f32 %v3341_v10, 0.0 }
 0x272   : > { %v1418_v16 = vmax.f32 %v3342_v12, 0.0 }
 0x273   : > { %v1465_v18 = vpack.c.bf16 %v1417_v14, %v1415_v13 }
 0x274   : > { %v1466_v20 = vpack.c.bf16 %v1418_v16, %v1416_v15  ;;  %v1308_v24 = vpop.f32.mrb[32].mxu0 }
 0x275   : > { %v3343_v25 = vadd.f32 %v1308_v24, %v4341_v22  ;;  %v1310_v26 = vpop.f32.mrb[33].mxu0 }
 0x276   : > { %v3344_v27 = vadd.f32 %v1310_v26, %v4345_v23  ;;  %v1312_v28 = vpop.f32.mrb[34].mxu0  ;;  %1706 = vmatprep.mubr.bf16.mxu1 %v1466_v20 }
 0x277   : > { %v3345_v29 = vadd.f32 %v1312_v28, %v4341_v22  ;;  %v1314_v30 = vpop.f32.mrb[35].mxu0  ;;  %1707 = vmatmul.mubr.bf16.gmra.mrb[28].mxu1 %v1465_v18  ;;  %v1419_v32 = vmax.f32 %v3343_v25, 0.0 }
 0x278   : > { %v3346_v31 = vadd.f32 %v1314_v30, %v4345_v23  ;;  %v1420_v34 = vmax.f32 %v3344_v27, 0.0 }
 0x279   : > { %v1421_v33 = vmax.f32 %v3345_v29, 0.0 }
 0x27a   : > { %v1422_v35 = vmax.f32 %v3346_v31, 0.0 }
 0x27b   : > { %v1467_v36 = vpack.c.bf16 %v1421_v33, %v1419_v32  ;;  %v3656_v33 = vld [vmem:[#allocation8 + $0x38] sm:$0xff]  }
 0x27c   : > { %v1468_v37 = vpack.c.bf16 %v1422_v35, %v1420_v34  ;;  %v1318_v38 = vpop.f32.mrb[36].mxu0  ;;  %3261 = vmatprep.subr.bf16.mxu1 %v3656_v33 }
 0x27d   : > { %v3347_v39 = vadd.f32 %v1318_v38, %v4341_v22  ;;  %v1320_v40 = vpop.f32.mrb[37].mxu0  ;;  %3262 = vmatpush3.bf16.msra.mxu1 %v3656_v33  ;;  %v4422_v33 = vld [vmem:[#allocation10 + $0x2c] ss:$16 sps:$4 sm:$0xff]  }
 0x27e   : > { %v3348_v41 = vadd.f32 %v1320_v40, %v4345_v23  ;;  %v1322_v42 = vpop.f32.mrb[38].mxu0  ;;  %1714 = vmatprep.mubr.bf16.mxu1 %v1468_v37 }
 0x27f   : > { %v3349_v43 = vadd.f32 %v1322_v42, %v4341_v22  ;;  %v1324_v44 = vpop.f32.mrb[39].mxu0  ;;  %1715 = vmatmul.mubr.bf16.gmra.mrb[32].mxu1 %v1467_v36  ;;  %v1423_v46 = vmax.f32 %v3347_v39, 0.0 }
 0x280   : > { %v3350_v45 = vadd.f32 %v1324_v44, %v4345_v23  ;;  %v1424_v48 = vmax.f32 %v3348_v41, 0.0 }
 0x281   : > { %v1425_v47 = vmax.f32 %v3349_v43, 0.0 }
 0x282   : > { %v1426_v49 = vmax.f32 %v3350_v45, 0.0 }
 0x283   : > { %v1469_v50 = vpack.c.bf16 %v1425_v47, %v1423_v46 }
 0x284   : > { %v1470_v51 = vpack.c.bf16 %v1426_v49, %v1424_v48  ;;  %v1328_v52 = vpop.f32.mrb[40].mxu0 }
 0x285   : > { %v3351_v53 = vadd.f32 %v1328_v52, %v4341_v22  ;;  %v1330_v54 = vpop.f32.mrb[41].mxu0 }
 0x286   : > { %v3352_v55 = vadd.f32 %v1330_v54, %v4345_v23  ;;  %v1332_v56 = vpop.f32.mrb[42].mxu0  ;;  %1722 = vmatprep.mubr.bf16.mxu1 %v1470_v51 }
 0x287   : > { %v3353_v57 = vadd.f32 %v1332_v56, %v4341_v22  ;;  %v1334_v58 = vpop.f32.mrb[43].mxu0  ;;  %1723 = vmatmul.mubr.bf16.gmra.mrb[36].mxu1 %v1469_v50  ;;  %v1427_v60 = vmax.f32 %v3351_v53, 0.0 }
 0x288   : > { %v3354_v59 = vadd.f32 %v1334_v58, %v4345_v23  ;;  %v1428_v62 = vmax.f32 %v3352_v55, 0.0 }
 0x289   : > { %v1429_v61 = vmax.f32 %v3353_v57, 0.0 }
 0x28a   : > { %v1430_v63 = vmax.f32 %v3354_v59, 0.0 }
 0x28b   : > { %v1471_v0 = vpack.c.bf16 %v1429_v61, %v1427_v60 }
 0x28c   : > { %v1472_v1 = vpack.c.bf16 %v1430_v63, %v1428_v62  ;;  %v1338_v2 = vpop.f32.mrb[44].mxu0 }
 0x28d   : > { %v3355_v3 = vadd.f32 %v1338_v2, %v4341_v22  ;;  %v1340_v4 = vpop.f32.mrb[45].mxu0 }
 0x28e   : > { %v3356_v5 = vadd.f32 %v1340_v4, %v4345_v23  ;;  %v1342_v6 = vpop.f32.mrb[46].mxu0  ;;  %1730 = vmatprep.mubr.bf16.mxu1 %v1472_v1 }
 0x28f   : > { %v3357_v7 = vadd.f32 %v1342_v6, %v4341_v22  ;;  %v1344_v8 = vpop.f32.mrb[47].mxu0  ;;  %1731 = vmatmul.mubr.bf16.gmra.mrb[40].mxu1 %v1471_v0  ;;  %v1431_v10 = vmax.f32 %v3355_v3, 0.0 }
 0x290   : > { %v3358_v9 = vadd.f32 %v1344_v8, %v4345_v23  ;;  %v1432_v12 = vmax.f32 %v3356_v5, 0.0 }
 0x291   : > { %v1433_v11 = vmax.f32 %v3357_v7, 0.0 }
 0x292   : > { %v1434_v13 = vmax.f32 %v3358_v9, 0.0 }
 0x293   : > { %v1473_v14 = vpack.c.bf16 %v1433_v11, %v1431_v10 }
 0x294   : > { %v1474_v15 = vpack.c.bf16 %v1434_v13, %v1432_v12  ;;  %v1348_v16 = vpop.f32.mrb[48].mxu0 }
 0x295   : > { %v3359_v18 = vadd.f32 %v1348_v16, %v4341_v22  ;;  %v1350_v20 = vpop.f32.mrb[49].mxu0 }
 0x296   : > { %v3360_v24 = vadd.f32 %v1350_v20, %v4345_v23  ;;  %v1352_v25 = vpop.f32.mrb[50].mxu0  ;;  %1738 = vmatprep.mubr.bf16.mxu1 %v1474_v15  ;;  %v4414_v15 = vld [vmem:[%s4913_s4] ss:$0 sm:$0xff] }
 0x297   : > { %v3361_v26 = vadd.f32 %v1352_v25, %v4341_v22  ;;  %v1354_v27 = vpop.f32.mrb[51].mxu0  ;;  %1739 = vmatmul.mubr.bf16.gmra.mrb[44].mxu1 %v1473_v14  ;;  %v1435_v29 = vmax.f32 %v3359_v18, 0.0  ;;  %v3659_v25 = vld [vmem:[#allocation10 + $0x4] ss:$16 sps:$4 sm:$0xff]  }
 0x298   : > { %v3362_v28 = vadd.f32 %v1354_v27, %v4345_v23  ;;  %v1436_v31 = vmax.f32 %v3360_v24, 0.0  ;;  %2321 = vmatprep.subr.bf16.mxu1 %v3659_v25  ;;  %v4418_v27 = vld [vmem:[#allocation10 + $0x8] ss:$16 sps:$4 sm:$0xff]  }
 0x299   : > { %v1437_v30 = vmax.f32 %v3361_v26, 0.0 }
 0x29a   : > { %v1438_v32 = vmax.f32 %v3362_v28, 0.0 }
 0x29b   : > { %v1475_v34 = vpack.c.bf16 %v1437_v30, %v1435_v29 }
 0x29c   : > { %v1476_v35 = vpack.c.bf16 %v1438_v32, %v1436_v31  ;;  %v1358_v36 = vpop.f32.mrb[52].mxu0  ;;  %v4420_v31 = vld [vmem:[#allocation10 + $0xc] ss:$16 sps:$4 sm:$0xff]  }
 0x29d   : > { %v3363_v37 = vadd.f32 %v1358_v36, %v4341_v22  ;;  %v1360_v38 = vpop.f32.mrb[53].mxu0  ;;  %2514 = vmatprep.subr.bf16.mxu0 %v4420_v31 }
 0x29e   : > { %v3364_v39 = vadd.f32 %v1360_v38, %v4345_v23  ;;  %v1362_v40 = vpop.f32.mrb[54].mxu0  ;;  %1746 = vmatprep.mubr.bf16.mxu1 %v1476_v35  ;;  %2515 = vmatpush1.bf16.msra.mxu0 %v4418_v27  ;;  %v4426_v38 = vld [vmem:[#allocation10 + $0x28] ss:$16 sps:$4 sm:$0xff]  }
 0x29f   : > { %v3365_v41 = vadd.f32 %v1362_v40, %v4341_v22  ;;  %v1364_v42 = vpop.f32.mrb[55].mxu0  ;;  %1747 = vmatmul.mubr.bf16.gmra.mrb[48].mxu1 %v1475_v34  ;;  %v1439_v44 = vmax.f32 %v3363_v37, 0.0  ;;  %2516 = vmatprep.subr.bf16.mxu0 %v4422_v33 }
 0x2a0   : > { %v3366_v43 = vadd.f32 %v1364_v42, %v4345_v23  ;;  %v1440_v46 = vmax.f32 %v3364_v39, 0.0 }
 0x2a1   : > { %v1441_v45 = vmax.f32 %v3365_v41, 0.0  ;;  %v4430_v41 = vld [vmem:[#allocation10 + $0x4c] ss:$16 sps:$4 sm:$0xff]  }
 0x2a2   : > { %v1442_v47 = vmax.f32 %v3366_v43, 0.0  ;;  %2517 = vmatpush1.bf16.msra.mxu0 %v4426_v38  ;;  %v4434_v43 = vld [vmem:[#allocation10 + $0x48] ss:$16 sps:$4 sm:$0xff]  }
 0x2a3   : > { %v1477_v48 = vpack.c.bf16 %v1441_v45, %v1439_v44  ;;  %2518 = vmatprep.subr.bf16.mxu0 %v4430_v41 }
 0x2a4   : > { %v1478_v49 = vpack.c.bf16 %v1442_v47, %v1440_v46  ;;  %v1368_v50 = vpop.f32.mrb[56].mxu0  ;;  %v4437_v47 = vld [vmem:[#allocation10 + $0x6c] ss:$16 sps:$4 sm:$0xff]  }
 0x2a5   : > { %v3367_v51 = vadd.f32 %v1368_v50, %v4341_v22  ;;  %v1370_v52 = vpop.f32.mrb[57].mxu0 }
 0x2a6   : > { %v3368_v53 = vadd.f32 %v1370_v52, %v4345_v23  ;;  %v1372_v54 = vpop.f32.mrb[58].mxu0  ;;  %1754 = vmatprep.mubr.bf16.mxu1 %v1478_v49  ;;  %v3657_v49 = vld [vmem:[#allocation10] ss:$16 sps:$4 sm:$0xff]   ;;  %2519 = vmatpush1.bf16.msra.mxu0 %v4434_v43 }
 0x2a7   : > { %v3369_v55 = vadd.f32 %v1372_v54, %v4341_v22  ;;  %v1374_v56 = vpop.f32.mrb[59].mxu0  ;;  %1755 = vmatmul.mubr.bf16.gmra.mrb[52].mxu1 %v1477_v48  ;;  %v1443_v58 = vmax.f32 %v3367_v51, 0.0  ;;  %2520 = vmatprep.subr.bf16.mxu0 %v4437_v47 }
 0x2a8   : > { %v3370_v57 = vadd.f32 %v1374_v56, %v4345_v23  ;;  %v1444_v60 = vmax.f32 %v3368_v53, 0.0  ;;  %v3662_v53 = vld [vmem:[#allocation10 + $0x24] ss:$16 sps:$4 sm:$0xff]  }
 0x2a9   : > { %v1445_v59 = vmax.f32 %v3369_v55, 0.0  ;;  %v4440_v55 = vld [vmem:[#allocation10 + $0x68] ss:$16 sps:$4 sm:$0xff]  }
 0x2aa   : > { %v1446_v61 = vmax.f32 %v3370_v57, 0.0  ;;  %2521 = vmatpush1.bf16.msra.mxu0 %v4440_v55 }
 0x2ab   : > { %v1479_v62 = vpack.c.bf16 %v1445_v59, %v1443_v58  ;;  %v4444_v58 = vld [vmem:[#allocation10 + $0x8c] ss:$16 sps:$4 sm:$0xff]   ;;  %v3660_v59 = vld [vmem:[#allocation10 + $0x20] ss:$16 sps:$4 sm:$0xff]  }
 0x2ac   : > { %v1480_v63 = vpack.c.bf16 %v1446_v61, %v1444_v60  ;;  %v1378_v0 = vpop.f32.mrb[60].mxu0  ;;  %v3665_v61 = vld [vmem:[#allocation10 + $0x44] ss:$16 sps:$4 sm:$0xff]   ;;  %2522 = vmatprep.subr.bf16.mxu0 %v4444_v58 }
 0x2ad   : > { %v3371_v1 = vadd.f32 %v1378_v0, %v4341_v22  ;;  %v1380_v2 = vpop.f32.mrb[61].mxu0 }
 0x2ae   : > { %v3372_v3 = vadd.f32 %v1380_v2, %v4345_v23  ;;  %v1382_v4 = vpop.f32.mrb[62].mxu0  ;;  %1762 = vmatprep.mubr.bf16.mxu1 %v1480_v63  ;;  %v4451_v2 = vld [vmem:[#allocation10 + $0xac] ss:$16 sps:$4 sm:$0xff]  }
 0x2af   : > { %v3373_v5 = vadd.f32 %v1382_v4, %v4341_v22  ;;  %v1384_v6 = vpop.f32.mrb[63].mxu0  ;;  %1763 = vmatmul.mubr.bf16.gmra.mrb[56].mxu1 %v1479_v62  ;;  %v1447_v8 = vmax.f32 %v3371_v1, 0.0  ;;  %v4448_v62 = vld [vmem:[#allocation10 + $0x88] ss:$16 sps:$4 sm:$0xff]   ;;  %v3663_v4 = vld [vmem:[#allocation10 + $0x40] ss:$16 sps:$4 sm:$0xff]  }
 0x2b0   : > { %v3374_v7 = vadd.f32 %v1384_v6, %v4345_v23  ;;  %v1448_v10 = vmax.f32 %v3372_v3, 0.0  ;;  %2523 = vmatpush1.bf16.msra.mxu0 %v4448_v62 }
 0x2b1   : > { %v1449_v9 = vmax.f32 %v3373_v5, 0.0  ;;  %2524 = vmatprep.subr.bf16.mxu0 %v4451_v2 }
 0x2b2   : > { %v1450_v11 = vmax.f32 %v3374_v7, 0.0 }
 0x2b3   : > { %v1481_v12 = vpack.c.bf16 %v1449_v9, %v1447_v8  ;;  %v3668_v8 = vld [vmem:[#allocation10 + $0x64] ss:$16 sps:$4 sm:$0xff]  }
 0x2b4   : > { %v1482_v13 = vpack.c.bf16 %v1450_v11, %v1448_v10  ;;  %v4454_v10 = vld [vmem:[#allocation10 + $0xa8] ss:$16 sps:$4 sm:$0xff]  }
 0x2b5   : > { %2525 = vmatpush1.bf16.msra.mxu0 %v4454_v10 }
 0x2b6   : > { %1770 = vmatprep.mubr.bf16.mxu1 %v1482_v13  ;;  %v3666_v13 = vld [vmem:[#allocation10 + $0x60] ss:$16 sps:$4 sm:$0xff]  }
 0x2b7   : > { %1771 = vmatmul.mubr.bf16.gmra.mrb[60].mxu1 %v1481_v12 }
 0x312   : > { %v3127_v14 = vpop.f32.mrb[0].mxu1 }
 0x313   : > { %v3128_v16 = vpop.f32.mrb[1].mxu1 }
 0x314   : > { %v3129_v22 = vadd.f32 %v3128_v16, %v3127_v14  ;;  %v3130_v18 = vpop.f32.mrb[2].mxu1  ;;  %v3671_v16 = vld [vmem:[#allocation10 + $0x84] ss:$16 sps:$4 sm:$0xff]  }
 0x315   : > { %v3131_v20 = vpop.f32.mrb[3].mxu1 }
 0x316   : > { %v1653_v23 = vadd.f32 %v3129_v22, %v4414_v15  ;;  %v3132_v24 = vadd.f32 %v3131_v20, %v3130_v18 }
 0x318   : > { %v1656_v26 = vadd.f32 %v3132_v24, %v4414_v15  ;;  %v1779_v28 = vmax.f32 %v1653_v23, 0.0  ;;  %v3669_v24 = vld [vmem:[#allocation10 + $0x80] ss:$16 sps:$4 sm:$0xff]  }
 0x31a   : > { %v1780_v29 = vmax.f32 %v1656_v26, 0.0  ;;  %v3133_v30 = vpop.f32.mrb[4].mxu1 }
 0x31b   : > { %v3134_v32 = vpop.f32.mrb[5].mxu1 }
 0x31c   : > { %v3135_v34 = vadd.f32 %v3134_v32, %v3133_v30  ;;  %v3136_v35 = vpop.f32.mrb[6].mxu1  ;;  %v1811_v36 = vpack.c.bf16 %v1780_v29, %v1779_v28  ;;  %v3680_v29 = vld [vmem:[#allocation10 + $0xa4] ss:$16 sps:$4 sm:$0xff]  }
 0x31d   : > { %v3137_v37 = vpop.f32.mrb[7].mxu1 }
 0x31e   : > { %v1661_v39 = vadd.f32 %v3135_v34, %v4414_v15  ;;  %v3138_v40 = vadd.f32 %v3137_v37, %v3136_v35  ;;  %3263 = vmatprep.mubr.bf16.mxu1 %v1811_v36  ;;  %v3678_v35 = vld [vmem:[#allocation10 + $0xa0] ss:$16 sps:$4 sm:$0xff]   ;;  %v3689_v37 = vld [vmem:[#allocation10 + $0xc4] ss:$16 sps:$4 sm:$0xff]  }
 0x320   : > { %v1664_v42 = vadd.f32 %v3138_v40, %v4414_v15  ;;  %v1781_v44 = vmax.f32 %v1661_v39, 0.0 }
 0x322   : > { %v1782_v45 = vmax.f32 %v1664_v42, 0.0  ;;  %v3139_v46 = vpop.f32.mrb[8].mxu1 }
 0x323   : > { %v3140_v48 = vpop.f32.mrb[9].mxu1 }
 0x324   : > { %v1812_v50 = vpack.c.bf16 %v1782_v45, %v1781_v44  ;;  %v3141_v51 = vadd.f32 %v3140_v48, %v3139_v46  ;;  %v3142_v52 = vpop.f32.mrb[10].mxu1  ;;  %v3687_v45 = vld [vmem:[#allocation10 + $0xc0] ss:$16 sps:$4 sm:$0xff]  }
 0x325   : > { %v3143_v54 = vpop.f32.mrb[11].mxu1 }
 0x326   : > { %v1669_v56 = vadd.f32 %v3141_v51, %v4414_v15  ;;  %v3144_v57 = vadd.f32 %v3143_v54, %v3142_v52  ;;  %3264 = vmatmul.mubr.bf16.vlgmr.msra.gmra.mrb[64].mxu1 %v1812_v50 }
 0x327   : > { %2322 = vmatpush1.bf16.msra.mxu1 %v3657_v49 }
 0x328   : > { %v1672_v60 = vadd.f32 %v3144_v57, %v4414_v15  ;;  %2323 = vmatprep.subr.bf16.mxu1 %v3662_v53  ;;  %v1783_v63 = vmax.f32 %v1669_v56, 0.0 }
 0x32a   : > { %v1784_v0 = vmax.f32 %v1672_v60, 0.0  ;;  %v3145_v1 = vpop.f32.mrb[12].mxu1 }
 0x32b   : > { %v3146_v3 = vpop.f32.mrb[13].mxu1  ;;  %2324 = vmatpush1.bf16.msra.mxu1 %v3660_v59 }
 0x32c   : > { %v3147_v5 = vadd.f32 %v3146_v3, %v3145_v1  ;;  %v3148_v6 = vpop.f32.mrb[14].mxu1  ;;  %v1813_v7 = vpack.c.bf16 %v1784_v0, %v1783_v63  ;;  %2325 = vmatprep.subr.bf16.mxu1 %v3665_v61 }
 0x32d   : > { %v3149_v9 = vpop.f32.mrb[15].mxu1 }
 0x32e   : > { %v1677_v11 = vadd.f32 %v3147_v5, %v4414_v15  ;;  %v3150_v12 = vadd.f32 %v3149_v9, %v3148_v6  ;;  %3267 = vmatprep.mubr.bf16.mxu1 %v1813_v7 }
 0x32f   : > { %2326 = vmatpush1.bf16.msra.mxu1 %v3663_v4 }
 0x330   : > { %v1680_v14 = vadd.f32 %v3150_v12, %v4414_v15  ;;  %2327 = vmatprep.subr.bf16.mxu1 %v3668_v8  ;;  %v1785_v22 = vmax.f32 %v1677_v11, 0.0 }
 0x332   : > { %v1786_v18 = vmax.f32 %v1680_v14, 0.0  ;;  %v3151_v20 = vpop.f32.mrb[16].mxu1 }
 0x333   : > { %v3152_v23 = vpop.f32.mrb[17].mxu1  ;;  %2328 = vmatpush1.bf16.msra.mxu1 %v3666_v13 }
 0x334   : > { %v3153_v25 = vadd.f32 %v3152_v23, %v3151_v20  ;;  %v3154_v26 = vpop.f32.mrb[18].mxu1  ;;  %v1814_v28 = vpack.c.bf16 %v1786_v18, %v1785_v22  ;;  %2329 = vmatprep.subr.bf16.mxu1 %v3671_v16 }
 0x335   : > { %v3155_v30 = vpop.f32.mrb[19].mxu1 }
 0x336   : > { %v1685_v32 = vadd.f32 %v3153_v25, %v4414_v15  ;;  %v3156_v34 = vadd.f32 %v3155_v30, %v3154_v26  ;;  %3268 = vmatmul.mubr.bf16.gmra.mrb[68].mxu1 %v1814_v28 }
 0x337   : > { %2330 = vmatpush1.bf16.msra.mxu1 %v3669_v24 }
 0x338   : > { %v1688_v36 = vadd.f32 %v3156_v34, %v4414_v15  ;;  %2331 = vmatprep.subr.bf16.mxu1 %v3680_v29  ;;  %v1787_v39 = vmax.f32 %v1685_v32, 0.0 }
 0x33a   : > { %v1788_v40 = vmax.f32 %v1688_v36, 0.0  ;;  %v3157_v42 = vpop.f32.mrb[20].mxu1 }
 0x33b   : > { %v3158_v44 = vpop.f32.mrb[21].mxu1  ;;  %2332 = vmatpush1.bf16.msra.mxu1 %v3678_v35 }
 0x33c   : > { %v3159_v46 = vadd.f32 %v3158_v44, %v3157_v42  ;;  %v3160_v48 = vpop.f32.mrb[22].mxu1  ;;  %v1815_v49 = vpack.c.bf16 %v1788_v40, %v1787_v39  ;;  %2333 = vmatprep.subr.bf16.mxu1 %v3689_v37 }
 0x33d   : > { %v3161_v50 = vpop.f32.mrb[23].mxu1 }
 0x33e   : > { %v1693_v51 = vadd.f32 %v3159_v46, %v4414_v15  ;;  %v3162_v52 = vadd.f32 %v3161_v50, %v3160_v48  ;;  %3271 = vmatprep.mubr.bf16.mxu1 %v1815_v49 }
 0x33f   : > { %2334 = vmatpush1.bf16.msra.mxu1 %v3687_v45 }
 0x340   : > { %v1696_v53 = vadd.f32 %v3162_v52, %v4414_v15  ;;  %v1789_v54 = vmax.f32 %v1693_v51, 0.0 }
 0x342   : > { %v1790_v56 = vmax.f32 %v1696_v53, 0.0  ;;  %v3163_v57 = vpop.f32.mrb[24].mxu1 }
 0x343   : > { %v3164_v59 = vpop.f32.mrb[25].mxu1 }
 0x344   : > { %v3165_v60 = vadd.f32 %v3164_v59, %v3163_v57  ;;  %v3166_v61 = vpop.f32.mrb[26].mxu1  ;;  %v1816_v63 = vpack.c.bf16 %v1790_v56, %v1789_v54 }
 0x345   : > { %v3167_v0 = vpop.f32.mrb[27].mxu1 }
 0x346   : > { %v1701_v1 = vadd.f32 %v3165_v60, %v4414_v15  ;;  %v3168_v3 = vadd.f32 %v3167_v0, %v3166_v61  ;;  %3272 = vmatmul.mubr.bf16.gmra.mrb[72].mxu1 %v1816_v63 }
 0x348   : > { %v1704_v4 = vadd.f32 %v3168_v3, %v4414_v15  ;;  %v1791_v5 = vmax.f32 %v1701_v1, 0.0 }
 0x34a   : > { %v1792_v6 = vmax.f32 %v1704_v4, 0.0  ;;  %v3169_v7 = vpop.f32.mrb[28].mxu1 }
 0x34b   : > { %v3170_v8 = vpop.f32.mrb[29].mxu1 }
 0x34c   : > { %v3171_v9 = vadd.f32 %v3170_v8, %v3169_v7  ;;  %v3172_v11 = vpop.f32.mrb[30].mxu1  ;;  %v1817_v12 = vpack.c.bf16 %v1792_v6, %v1791_v5 }
 0x34d   : > { %v3173_v13 = vpop.f32.mrb[31].mxu1 }
 0x34e   : > { %v1709_v14 = vadd.f32 %v3171_v9, %v4414_v15  ;;  %v3174_v16 = vadd.f32 %v3173_v13, %v3172_v11  ;;  %3275 = vmatprep.mubr.bf16.mxu1 %v1817_v12 }
 0x350   : > { %v1712_v22 = vadd.f32 %v3174_v16, %v4414_v15  ;;  %v1793_v18 = vmax.f32 %v1709_v14, 0.0 }
 0x352   : > { %v1794_v20 = vmax.f32 %v1712_v22, 0.0  ;;  %v3175_v23 = vpop.f32.mrb[32].mxu1 }
 0x353   : > { %v3176_v24 = vpop.f32.mrb[33].mxu1 }
 0x354   : > { %v3177_v25 = vadd.f32 %v3176_v24, %v3175_v23  ;;  %v3178_v26 = vpop.f32.mrb[34].mxu1  ;;  %v1818_v28 = vpack.c.bf16 %v1794_v20, %v1793_v18 }
 0x355   : > { %v3179_v29 = vpop.f32.mrb[35].mxu1 }
 0x356   : > { %v1717_v30 = vadd.f32 %v3177_v25, %v4414_v15  ;;  %v3180_v32 = vadd.f32 %v3179_v29, %v3178_v26  ;;  %3276 = vmatmul.mubr.bf16.gmra.mrb[76].mxu1 %v1818_v28  ;;  %v4478_v29 = vld [vmem:[#allocation10 + $0xcc] ss:$16 sps:$4 sm:$0xff]  }
 0x357   : > { %2526 = vmatprep.subr.bf16.mxu0 %v4478_v29 }
 0x358   : > { %v1720_v34 = vadd.f32 %v3180_v32, %v4414_v15  ;;  %v1795_v35 = vmax.f32 %v1717_v30, 0.0 }
 0x35a   : > { %v1796_v36 = vmax.f32 %v1720_v34, 0.0  ;;  %v3181_v37 = vpop.f32.mrb[36].mxu1 }
 0x35b   : > { %v3182_v39 = vpop.f32.mrb[37].mxu1 }
 0x35c   : > { %v3183_v40 = vadd.f32 %v3182_v39, %v3181_v37  ;;  %v3184_v42 = vpop.f32.mrb[38].mxu1  ;;  %v1819_v44 = vpack.c.bf16 %v1796_v36, %v1795_v35  ;;  %v4480_v35 = vld [vmem:[#allocation10 + $0xc8] ss:$16 sps:$4 sm:$0xff]  }
 0x35d   : > { %v3185_v45 = vpop.f32.mrb[39].mxu1  ;;  %2527 = vmatpush1.bf16.msra.mxu0 %v4480_v35 }
 0x35e   : > { %v1725_v46 = vadd.f32 %v3183_v40, %v4414_v15  ;;  %v3186_v48 = vadd.f32 %v3185_v45, %v3184_v42  ;;  %3279 = vmatprep.mubr.bf16.mxu1 %v1819_v44  ;;  %v3698_v44 = vld [vmem:[#allocation10 + $0xe4] ss:$16 sps:$4 sm:$0xff]   ;;  %v4484_v45 = vld [vmem:[#allocation10 + $0xec] ss:$16 sps:$4 sm:$0xff]  }
 0x35f   : > { %2335 = vmatprep.subr.bf16.mxu1 %v3698_v44  ;;  %2528 = vmatprep.subr.bf16.mxu0 %v4484_v45 }
 0x360   : > { %v1728_v49 = vadd.f32 %v3186_v48, %v4414_v15  ;;  %v1797_v50 = vmax.f32 %v1725_v46, 0.0 }
 0x362   : > { %v1798_v51 = vmax.f32 %v1728_v49, 0.0  ;;  %v3187_v52 = vpop.f32.mrb[40].mxu1  ;;  %v3696_v49 = vld [vmem:[#allocation10 + $0xe0] ss:$16 sps:$4 sm:$0xff]  }
 0x363   : > { %v3188_v53 = vpop.f32.mrb[41].mxu1  ;;  %2336 = vmatpush1.bf16.msra.mxu1 %v3696_v49 }
 0x364   : > { %v3189_v54 = vadd.f32 %v3188_v53, %v3187_v52  ;;  %v3190_v56 = vpop.f32.mrb[42].mxu1  ;;  %v1820_v57 = vpack.c.bf16 %v1798_v51, %v1797_v50  ;;  %v4487_v50 = vld [vmem:[#allocation10 + $0xe8] ss:$16 sps:$4 sm:$0xff]   ;;  %3295 = vmatprep.subr.bf16.mxu1 %v4420_v31 }
 0x365   : > { %v3191_v59 = vpop.f32.mrb[43].mxu1  ;;  %2529 = vmatpush1.bf16.msra.mxu0 %v4487_v50 }
 0x366   : > { %v1733_v60 = vadd.f32 %v3189_v54, %v4414_v15  ;;  %v3192_v61 = vadd.f32 %v3191_v59, %v3190_v56  ;;  %3280 = vmatmul.mubr.bf16.gmra.mrb[80].mxu1 %v1820_v57  ;;  %v3936_v56 = vmov 0  }
 0x367   : > { %2546 = vmatprep.mubr.bf16.mxu0 %v3936_v56 }
 0x368   : > { %v1736_v63 = vadd.f32 %v3192_v61, %v4414_v15  ;;  %v1799_v0 = vmax.f32 %v1733_v60, 0.0 }
 0x36a   : > { %v1800_v1 = vmax.f32 %v1736_v63, 0.0  ;;  %v3193_v3 = vpop.f32.mrb[44].mxu1 }
 0x36b   : > { %v3194_v4 = vpop.f32.mrb[45].mxu1 }
 0x36c   : > { %v3195_v5 = vadd.f32 %v3194_v4, %v3193_v3  ;;  %v3196_v6 = vpop.f32.mrb[46].mxu1  ;;  %v1821_v7 = vpack.c.bf16 %v1800_v1, %v1799_v0 }
 0x36d   : > { %v3197_v8 = vpop.f32.mrb[47].mxu1 }
 0x36e   : > { %v1741_v9 = vadd.f32 %v3195_v5, %v4414_v15  ;;  %v3198_v11 = vadd.f32 %v3197_v8, %v3196_v6  ;;  %3283 = vmatprep.mubr.bf16.mxu1 %v1821_v7 }
 0x370   : > { %v1744_v12 = vadd.f32 %v3198_v11, %v4414_v15  ;;  %v1801_v13 = vmax.f32 %v1741_v9, 0.0 }
 0x372   : > { %v1802_v14 = vmax.f32 %v1744_v12, 0.0  ;;  %v3199_v16 = vpop.f32.mrb[48].mxu1 }
 0x373   : > { %v3200_v22 = vpop.f32.mrb[49].mxu1 }
 0x374   : > { %v3201_v18 = vadd.f32 %v3200_v22, %v3199_v16  ;;  %v3202_v20 = vpop.f32.mrb[50].mxu1  ;;  %v1822_v23 = vpack.c.bf16 %v1802_v14, %v1801_v13 }
 0x375   : > { %v3203_v24 = vpop.f32.mrb[51].mxu1 }
 0x376   : > { %v1749_v25 = vadd.f32 %v3201_v18, %v4414_v15  ;;  %v3204_v26 = vadd.f32 %v3203_v24, %v3202_v20  ;;  %3284 = vmatmul.mubr.bf16.gmra.mrb[84].mxu1 %v1822_v23  ;;  %v4502_v20 = vld [vmem:[%s4915_s6] ss:$0 sm:$0xff] }
 0x378   : > { %v1752_v28 = vadd.f32 %v3204_v26, %v4414_v15  ;;  %v1803_v30 = vmax.f32 %v1749_v25, 0.0 }
 0x37a   : > { %v1804_v32 = vmax.f32 %v1752_v28, 0.0  ;;  %v3205_v34 = vpop.f32.mrb[52].mxu1 }
 0x37b   : > { %v3206_v36 = vpop.f32.mrb[53].mxu1 }
 0x37c   : > { %v3207_v37 = vadd.f32 %v3206_v36, %v3205_v34  ;;  %v3208_v39 = vpop.f32.mrb[54].mxu1  ;;  %v1823_v40 = vpack.c.bf16 %v1804_v32, %v1803_v30 }
 0x37d   : > { %v3209_v42 = vpop.f32.mrb[55].mxu1 }
 0x37e   : > { %v1757_v46 = vadd.f32 %v3207_v37, %v4414_v15  ;;  %v3210_v48 = vadd.f32 %v3209_v42, %v3208_v39  ;;  %3287 = vmatprep.mubr.bf16.mxu1 %v1823_v40 }
 0x380   : > { %v1760_v51 = vadd.f32 %v3210_v48, %v4414_v15  ;;  %v1805_v52 = vmax.f32 %v1757_v46, 0.0 }
 0x382   : > { %v1806_v53 = vmax.f32 %v1760_v51, 0.0  ;;  %v3211_v54 = vpop.f32.mrb[56].mxu1 }
 0x383   : > { %v3212_v57 = vpop.f32.mrb[57].mxu1 }
 0x384   : > { %v3213_v59 = vadd.f32 %v3212_v57, %v3211_v54  ;;  %v3214_v60 = vpop.f32.mrb[58].mxu1  ;;  %v1824_v61 = vpack.c.bf16 %v1806_v53, %v1805_v52 }
 0x385   : > { %v3215_v63 = vpop.f32.mrb[59].mxu1 }
 0x386   : > { %v1765_v0 = vadd.f32 %v3213_v59, %v4414_v15  ;;  %v3216_v1 = vadd.f32 %v3215_v63, %v3214_v60  ;;  %3288 = vmatmul.mubr.bf16.gmra.mrb[88].mxu1 %v1824_v61 }
 0x388   : > { %v1768_v3 = vadd.f32 %v3216_v1, %v4414_v15  ;;  %v1807_v4 = vmax.f32 %v1765_v0, 0.0 }
 0x38a   : > { %v1808_v5 = vmax.f32 %v1768_v3, 0.0  ;;  %v3217_v31 = vpop.f32.mrb[60].mxu1 }
 0x38b   : > { %v3218_v6 = vpop.f32.mrb[61].mxu1 }
 0x38c   : > { %v3219_v7 = vadd.f32 %v3218_v6, %v3217_v31  ;;  %v3220_v8 = vpop.f32.mrb[62].mxu1  ;;  %v1825_v9 = vpack.c.bf16 %v1808_v5, %v1807_v4 }
 0x38d   : > { %v3221_v11 = vpop.f32.mrb[63].mxu1 }
 0x38e   : > { %v1773_v12 = vadd.f32 %v3219_v7, %v4414_v15  ;;  %v3222_v13 = vadd.f32 %v3221_v11, %v3220_v8  ;;  %3291 = vmatprep.mubr.bf16.mxu1 %v1825_v9 }
 0x390   : > { %v1776_v14 = vadd.f32 %v3222_v13, %v4414_v15  ;;  %v1809_v16 = vmax.f32 %v1773_v12, 0.0 }
 0x392   : > { %v1810_v22 = vmax.f32 %v1776_v14, 0.0 }
 0x394   : > { %v1826_v18 = vpack.c.bf16 %v1810_v22, %v1809_v16 }
 0x396   : > { %3292 = vmatmul.mubr.bf16.gmra.mrb[92].mxu1 %v1826_v18 }
 0x397   : > { %2353 = vmatprep.mubr.bf16.mxu1 %v3936_v56 }
 0x3f9   : > { %v3265_v23 = vpop.f32.mrb[64].mxu1 }
 0x3fa   : > { %v1941_v24 = vadd.f32 %v3265_v23, %v4502_v20  ;;  %v1932_v25 = vpop.f32.mrb[65].mxu1 }
 0x3fb   : > { %v1933_v26 = vadd.f32 %v4502_v20, %v1932_v25  ;;  %v3266_v28 = vpop.f32.mrb[66].mxu1 }
 0x3fc   : > { %v1944_v15 = vadd.f32 %v3266_v28, %v4502_v20  ;;  %v1935_v30 = vpop.f32.mrb[67].mxu1  ;;  %v2061_v34 = vmax.f32 %v1941_v24, 0.0 }
 0x3fd   : > { %v1936_v32 = vadd.f32 %v4502_v20, %v1935_v30  ;;  %v2059_v37 = vmax.f32 %v1933_v26, 0.0 }
 0x3fe   : > { %v2062_v36 = vmax.f32 %v1944_v15, 0.0 }
 0x3ff   : > { %v2060_v39 = vmax.f32 %v1936_v32, 0.0 }
 0x400   : > { %v2092_v40 = vpack.c.bf16 %v2062_v36, %v2061_v34 }
 0x401   : > { %v2091_v42 = vpack.c.bf16 %v2060_v39, %v2059_v37 }
 0x403   : > { %2354 = vmatmul.mubr.bf16.vlgmr.msra.gmra.mrb[96].mxu1 %v2091_v42  ;;  %2547 = vmatmul.mubr.bf16.vlgmr.msra.gmra.mrb[64].mxu0 %v2091_v42 }
 0x404   : > { %3303 = vmatpush1.bf16.msra.mxu1 %v4418_v27  ;;  %2363 = vmatprep.mubr.bf16.mxu1 %v3936_v56 }
 0x405   : > { %2556 = vmatprep.mubr.bf16.mxu0 %v3936_v56  ;;  %3296 = vmatprep.subr.bf16.mxu1 %v4422_v33 }
 0x408   : > { %3304 = vmatpush1.bf16.msra.mxu1 %v4426_v38 }
 0x409   : > { %v3269_v44 = vpop.f32.mrb[68].mxu1  ;;  %3297 = vmatprep.subr.bf16.mxu1 %v4430_v41 }
 0x40a   : > { %v1957_v46 = vadd.f32 %v3269_v44, %v4502_v20  ;;  %v1948_v48 = vpop.f32.mrb[69].mxu1 }
 0x40b   : > { %v1949_v49 = vadd.f32 %v4502_v20, %v1948_v48  ;;  %v3270_v51 = vpop.f32.mrb[70].mxu1  ;;  %2364 = vmatmul.mubr.bf16.gmra.mrb[100].mxu1 %v2092_v40  ;;  %2557 = vmatmul.mubr.bf16.gmra.mrb[68].mxu0 %v2092_v40 }
 0x40c   : > { %v1960_v27 = vadd.f32 %v3270_v51, %v4502_v20  ;;  %v1951_v52 = vpop.f32.mrb[71].mxu1  ;;  %2373 = vmatprep.mubr.bf16.mxu1 %v3936_v56  ;;  %2566 = vmatprep.mubr.bf16.mxu0 %v3936_v56  ;;  %v2065_v38 = vmax.f32 %v1957_v46, 0.0 }
 0x40d   : > { %v1952_v33 = vadd.f32 %v4502_v20, %v1951_v52  ;;  %3305 = vmatpush1.bf16.msra.mxu1 %v4434_v43  ;;  %v2063_v53 = vmax.f32 %v1949_v49, 0.0 }
 0x40e   : > { %v2066_v41 = vmax.f32 %v1960_v27, 0.0  ;;  %3298 = vmatprep.subr.bf16.mxu1 %v4437_v47 }
 0x40f   : > { %v2064_v54 = vmax.f32 %v1952_v33, 0.0 }
 0x410   : > { %v2094_v57 = vpack.c.bf16 %v2066_v41, %v2065_v38 }
 0x411   : > { %v2093_v59 = vpack.c.bf16 %v2064_v54, %v2063_v53  ;;  %3306 = vmatpush1.bf16.msra.mxu1 %v4440_v55 }
 0x412   : > { %3299 = vmatprep.subr.bf16.mxu1 %v4444_v58 }
 0x413   : > { %2374 = vmatmul.mubr.bf16.gmra.mrb[104].mxu1 %v2093_v59  ;;  %2567 = vmatmul.mubr.bf16.gmra.mrb[72].mxu0 %v2093_v59 }
 0x414   : > { %2383 = vmatprep.mubr.bf16.mxu1 %v3936_v56  ;;  %2576 = vmatprep.mubr.bf16.mxu0 %v3936_v56 }
 0x415   : > { %3307 = vmatpush1.bf16.msra.mxu1 %v4448_v62 }
 0x416   : > { %3300 = vmatprep.subr.bf16.mxu1 %v4451_v2 }
 0x419   : > { %v3273_v43 = vpop.f32.mrb[72].mxu1  ;;  %3308 = vmatpush1.bf16.msra.mxu1 %v4454_v10 }
 0x41a   : > { %v1973_v47 = vadd.f32 %v3273_v43, %v4502_v20  ;;  %v1964_v60 = vpop.f32.mrb[73].mxu1  ;;  %3301 = vmatprep.subr.bf16.mxu1 %v4478_v29 }
 0x41b   : > { %v1965_v55 = vadd.f32 %v4502_v20, %v1964_v60  ;;  %v3274_v58 = vpop.f32.mrb[74].mxu1  ;;  %2384 = vmatmul.mubr.bf16.gmra.mrb[108].mxu1 %v2094_v57  ;;  %2577 = vmatmul.mubr.bf16.gmra.mrb[76].mxu0 %v2094_v57 }
 0x41c   : > { %v1976_v61 = vadd.f32 %v3274_v58, %v4502_v20  ;;  %v1967_v63 = vpop.f32.mrb[75].mxu1  ;;  %2393 = vmatprep.mubr.bf16.mxu1 %v3936_v56  ;;  %2586 = vmatprep.mubr.bf16.mxu0 %v3936_v56  ;;  %v2069_v2 = vmax.f32 %v1973_v47, 0.0 }
 0x41d   : > { %v1968_v62 = vadd.f32 %v4502_v20, %v1967_v63  ;;  %3309 = vmatpush1.bf16.msra.mxu1 %v4480_v35  ;;  %v2067_v29 = vmax.f32 %v1965_v55, 0.0 }
 0x41e   : > { %v2070_v10 = vmax.f32 %v1976_v61, 0.0  ;;  %3302 = vmatprep.subr.bf16.mxu1 %v4484_v45 }
 0x41f   : > { %v2068_v0 = vmax.f32 %v1968_v62, 0.0 }
 0x420   : > { %v2096_v1 = vpack.c.bf16 %v2070_v10, %v2069_v2 }
 0x421   : > { %v2095_v3 = vpack.c.bf16 %v2068_v0, %v2067_v29  ;;  %3310 = vmatpush1.bf16.msra.mxu1 %v4487_v50 }
 0x423   : > { %2394 = vmatmul.mubr.bf16.gmra.mrb[112].mxu1 %v2095_v3  ;;  %2587 = vmatmul.mubr.bf16.gmra.mrb[80].mxu0 %v2095_v3 }
 0x424   : > { %2403 = vmatprep.mubr.bf16.mxu1 %v3936_v56  ;;  %2596 = vmatprep.mubr.bf16.mxu0 %v3936_v56 }
 0x429   : > { %v3277_v4 = vpop.f32.mrb[76].mxu1 }
 0x42a   : > { %v1989_v5 = vadd.f32 %v3277_v4, %v4502_v20  ;;  %v1980_v35 = vpop.f32.mrb[77].mxu1 }
 0x42b   : > { %v1981_v31 = vadd.f32 %v4502_v20, %v1980_v35  ;;  %v3278_v6 = vpop.f32.mrb[78].mxu1  ;;  %2404 = vmatmul.mubr.bf16.gmra.mrb[116].mxu1 %v2096_v1  ;;  %2597 = vmatmul.mubr.bf16.gmra.mrb[84].mxu0 %v2096_v1 }
 0x42c   : > { %v1992_v45 = vadd.f32 %v3278_v6, %v4502_v20  ;;  %v1983_v7 = vpop.f32.mrb[79].mxu1  ;;  %2413 = vmatprep.mubr.bf16.mxu1 %v3936_v56  ;;  %2606 = vmatprep.mubr.bf16.mxu0 %v3936_v56  ;;  %v2073_v8 = vmax.f32 %v1989_v5, 0.0 }
 0x42d   : > { %v1984_v50 = vadd.f32 %v4502_v20, %v1983_v7  ;;  %v2071_v11 = vmax.f32 %v1981_v31, 0.0 }
 0x42e   : > { %v2074_v9 = vmax.f32 %v1992_v45, 0.0 }
 0x42f   : > { %v2072_v12 = vmax.f32 %v1984_v50, 0.0 }
 0x430   : > { %v2098_v13 = vpack.c.bf16 %v2074_v9, %v2073_v8 }
 0x431   : > { %v2097_v14 = vpack.c.bf16 %v2072_v12, %v2071_v11  ;;  %v2155_v12 = vsub.s32 3, %v4332_v17 }
 0x433   : > { %2414 = vmatmul.mubr.bf16.gmra.mrb[120].mxu1 %v2097_v14  ;;  %2607 = vmatmul.mubr.bf16.gmra.mrb[88].mxu0 %v2097_v14 }
 0x434   : > { %2423 = vmatprep.mubr.bf16.mxu1 %v3936_v56  ;;  %2616 = vmatprep.mubr.bf16.mxu0 %v3936_v56 }
 0x439   : > { %v3281_v16 = vpop.f32.mrb[80].mxu1 }
 0x43a   : > { %v2005_v22 = vadd.f32 %v3281_v16, %v4502_v20  ;;  %v1996_v18 = vpop.f32.mrb[81].mxu1 }
 0x43b   : > { %v1997_v23 = vadd.f32 %v4502_v20, %v1996_v18  ;;  %v3282_v24 = vpop.f32.mrb[82].mxu1  ;;  %2424 = vmatmul.mubr.bf16.gmra.mrb[124].mxu1 %v2098_v13  ;;  %2617 = vmatmul.mubr.bf16.gmra.mrb[92].mxu0 %v2098_v13  ;;  %v2139_v13 = vld [vmem:[%s4943_s26] sm:$0xf] }
 0x43c   : > { %v2008_v25 = vadd.f32 %v3282_v24, %v4502_v20  ;;  %v1999_v26 = vpop.f32.mrb[83].mxu1  ;;  %2433 = vmatprep.mubr.bf16.mxu1 %v3936_v56  ;;  %2626 = vmatprep.mubr.bf16.mxu0 %v3936_v56  ;;  %v2077_v15 = vmax.f32 %v2005_v22, 0.0  ;;  %v4588_v14 = vrot.slane %v2139_v13, %v673_v19  ;;  %v4594_v22 = vrot.slane %v2139_v13, %v677_v21 }
 0x43d   : > { %v2000_v28 = vadd.f32 %v4502_v20, %v1999_v26  ;;  %v2075_v32 = vmax.f32 %v1997_v23, 0.0 }
 0x43e   : > { %v2078_v30 = vmax.f32 %v2008_v25, 0.0 }
 0x43f   : > { %v2076_v34 = vmax.f32 %v2000_v28, 0.0 }
 0x440   : > { %v2100_v36 = vpack.c.bf16 %v2078_v30, %v2077_v15 }
 0x441   : > { %v2099_v37 = vpack.c.bf16 %v2076_v34, %v2075_v32 }
 0x443   : > { %2434 = vmatmul.mubr.bf16.gmra.mrb[128].mxu1 %v2099_v37  ;;  %2627 = vmatmul.mubr.bf16.gmra.mrb[96].mxu0 %v2099_v37 }
 0x444   : > { %2443 = vmatprep.mubr.bf16.mxu1 %v3936_v56  ;;  %2636 = vmatprep.mubr.bf16.mxu0 %v3936_v56 }
 0x449   : > { %v3285_v39 = vpop.f32.mrb[84].mxu1 }
 0x44a   : > { %v2021_v40 = vadd.f32 %v3285_v39, %v4502_v20  ;;  %v2012_v42 = vpop.f32.mrb[85].mxu1 }
 0x44b   : > { %v2013_v44 = vadd.f32 %v4502_v20, %v2012_v42  ;;  %v3286_v46 = vpop.f32.mrb[86].mxu1  ;;  %2444 = vmatmul.mubr.bf16.gmra.mrb[132].mxu1 %v2100_v36  ;;  %2637 = vmatmul.mubr.bf16.gmra.mrb[100].mxu0 %v2100_v36 }
 0x44c   : > { %v2024_v48 = vadd.f32 %v3286_v46, %v4502_v20  ;;  %v2015_v49 = vpop.f32.mrb[87].mxu1  ;;  %2453 = vmatprep.mubr.bf16.mxu1 %v3936_v56  ;;  %v2081_v27 = vmax.f32 %v2021_v40, 0.0 }
 0x44d   : > { %v2016_v51 = vadd.f32 %v4502_v20, %v2015_v49  ;;  %v2079_v33 = vmax.f32 %v2013_v44, 0.0 }
 0x44e   : > { %v2082_v52 = vmax.f32 %v2024_v48, 0.0 }
 0x44f   : > { %v2080_v38 = vmax.f32 %v2016_v51, 0.0 }
 0x450   : > { %v2102_v41 = vpack.c.bf16 %v2082_v52, %v2081_v27 }
 0x451   : > { %v2101_v53 = vpack.c.bf16 %v2080_v38, %v2079_v33 }
 0x453   : > { %2454 = vmatmul.mubr.bf16.gmra.mrb[136].mxu1 %v2101_v53 }
 0x454   : > { %2463 = vmatprep.mubr.bf16.mxu1 %v3936_v56 }
 0x459   : > { %v3289_v54 = vpop.f32.mrb[88].mxu1 }
 0x45a   : > { %v2037_v57 = vadd.f32 %v3289_v54, %v4502_v20  ;;  %v2028_v59 = vpop.f32.mrb[89].mxu1 }
 0x45b   : > { %v2029_v43 = vadd.f32 %v4502_v20, %v2028_v59  ;;  %v3290_v47 = vpop.f32.mrb[90].mxu1  ;;  %2464 = vmatmul.mubr.bf16.gmra.mrb[140].mxu1 %v2102_v41 }
 0x45c   : > { %v2040_v60 = vadd.f32 %v3290_v47, %v4502_v20  ;;  %v2031_v55 = vpop.f32.mrb[91].mxu1  ;;  %2473 = vmatprep.mubr.bf16.mxu1 %v3936_v56  ;;  %v2085_v61 = vmax.f32 %v2037_v57, 0.0 }
 0x45d   : > { %v2032_v58 = vadd.f32 %v4502_v20, %v2031_v55  ;;  %v2083_v62 = vmax.f32 %v2029_v43, 0.0 }
 0x45e   : > { %v2086_v63 = vmax.f32 %v2040_v60, 0.0 }
 0x45f   : > { %v2084_v2 = vmax.f32 %v2032_v58, 0.0 }
 0x460   : > { %v2104_v10 = vpack.c.bf16 %v2086_v63, %v2085_v61 }
 0x461   : > { %v2103_v29 = vpack.c.bf16 %v2084_v2, %v2083_v62 }
 0x463   : > { %2474 = vmatmul.mubr.bf16.gmra.mrb[144].mxu1 %v2103_v29 }
 0x464   : > { %2483 = vmatprep.mubr.bf16.mxu1 %v3936_v56 }
 0x469   : > { %v3293_v0 = vpop.f32.mrb[92].mxu1 }
 0x46a   : > { %v2053_v1 = vadd.f32 %v3293_v0, %v4502_v20  ;;  %v2044_v3 = vpop.f32.mrb[93].mxu1 }
 0x46b   : > { %v2045_v4 = vadd.f32 %v4502_v20, %v2044_v3  ;;  %v3294_v5 = vpop.f32.mrb[94].mxu1  ;;  %2484 = vmatmul.mubr.bf16.gmra.mrb[148].mxu1 %v2104_v10 }
 0x46c   : > { %v2056_v35 = vadd.f32 %v3294_v5, %v4502_v20  ;;  %v2047_v31 = vpop.f32.mrb[95].mxu1  ;;  %2493 = vmatprep.mubr.bf16.mxu1 %v3936_v56  ;;  %v2089_v45 = vmax.f32 %v2053_v1, 0.0 }
 0x46d   : > { %v2048_v6 = vadd.f32 %v4502_v20, %v2047_v31  ;;  %v2087_v50 = vmax.f32 %v2045_v4, 0.0  ;;  %v2151_v20 = vsub.s32 2, %v4332_v17 }
 0x46e   : > { %v2090_v7 = vmax.f32 %v2056_v35, 0.0 }
 0x46f   : > { %v2088_v8 = vmax.f32 %v2048_v6, 0.0  ;;  %v4590_v16 = vrot.slane %v2139_v13, %v2151_v20 }
 0x470   : > { %v2106_v9 = vpack.c.bf16 %v2090_v7, %v2089_v45 }
 0x471   : > { %v2105_v11 = vpack.c.bf16 %v2088_v8, %v2087_v50 }
 0x473   : > { %2494 = vmatmul.mubr.bf16.gmra.mrb[152].mxu1 %v2105_v11 }
 0x474   : > { %2503 = vmatprep.mubr.bf16.mxu1 %v3936_v56 }
 0x47b   : > { %2504 = vmatmul.mubr.bf16.gmra.mrb[156].mxu1 %v2106_v9 }
 0x47c   : > { %2646 = vmatprep.mubr.bf16.mxu1 %v3936_v56 }
 0x483   : > { %2647 = vmatmul.mubr.bf16.vlgmr.msra.gmra.mrb[160].mxu1 %v2101_v53 }
 0x484   : > { %2656 = vmatprep.mubr.bf16.mxu1 %v3936_v56 }
 0x48b   : > { %2657 = vmatmul.mubr.bf16.gmra.mrb[164].mxu1 %v2102_v41 }
 0x48c   : > { %2666 = vmatprep.mubr.bf16.mxu1 %v3936_v56 }
 0x493   : > { %2667 = vmatmul.mubr.bf16.gmra.mrb[168].mxu1 %v2103_v29 }
 0x494   : > { %2676 = vmatprep.mubr.bf16.mxu1 %v3936_v56 }
 0x49b   : > { %2677 = vmatmul.mubr.bf16.gmra.mrb[172].mxu1 %v2104_v10 }
 0x49c   : > { %2686 = vmatprep.mubr.bf16.mxu1 %v3936_v56 }
 0x4a3   : > { %2687 = vmatmul.mubr.bf16.gmra.mrb[176].mxu1 %v2105_v11 }
 0x4a4   : > { %2696 = vmatprep.mubr.bf16.mxu1 %v3936_v56  ;;  %v4596_v56 = vrot.slane %v2139_v13, %v2155_v12 }
 0x4ab   : > { %2697 = vmatmul.mubr.bf16.gmra.mrb[180].mxu1 %v2106_v9 }
 0x4d6   : > { %v2355_v18 = vpop.f32.mrb[96].mxu1  ;;  %v2548_v23 = vpop.f32.mrb[64].mxu0 }
 0x4d7   : > { %v2356_v24 = vadd.f32 %v2355_v18, %v4588_v14  ;;  %v2549_v25 = vadd.f32 %v2548_v23, %v4590_v16  ;;  %v2357_v26 = vpop.f32.mrb[97].mxu1  ;;  %v2550_v28 = vpop.f32.mrb[65].mxu0 }
 0x4d8   : > { %v2358_v15 = vadd.f32 %v2357_v26, %v4594_v22  ;;  %v2551_v19 = vadd.f32 %v2550_v28, %v4596_v56  ;;  %v2359_v30 = vpop.f32.mrb[98].mxu1  ;;  %v2552_v32 = vpop.f32.mrb[66].mxu0 }
 0x4d9   : > { %2707 = vst [vmem:[%s4604_s14] sm:$0xff] %v2356_v24  ;;  %2709 = vst [vmem:[%s4604_s14 + $0x10] sm:$0xff] %v2549_v25  ;;  %v2360_v17 = vadd.f32 %v2359_v30, %v4588_v14  ;;  %v2553_v21 = vadd.f32 %v2552_v32, %v4590_v16  ;;  %v2361_v34 = vpop.f32.mrb[99].mxu1  ;;  %v2554_v36 = vpop.f32.mrb[67].mxu0 }
 0x4da   : > { %2708 = vst [vmem:[%s4604_s14 + $0x8] sm:$0xff] %v2358_v15  ;;  %2710 = vst [vmem:[%s4604_s14 + $0x18] sm:$0xff] %v2551_v19  ;;  %v2362_v37 = vadd.f32 %v2361_v34, %v4594_v22  ;;  %v2555_v39 = vadd.f32 %v2554_v36, %v4596_v56 }
 0x4db   : > { %2711 = vst [vmem:[%s4604_s14 + $0x20] sm:$0xff] %v2360_v17  ;;  %2713 = vst [vmem:[%s4604_s14 + $0x30] sm:$0xff] %v2553_v21 }
 0x4dc   : > { %2712 = vst [vmem:[%s4604_s14 + $0x28] sm:$0xff] %v2362_v37  ;;  %2714 = vst [vmem:[%s4604_s14 + $0x38] sm:$0xff] %v2555_v39 }
 0x4de   : > { %v2365_v40 = vpop.f32.mrb[100].mxu1  ;;  %v2558_v42 = vpop.f32.mrb[68].mxu0 }
 0x4df   : > { %v2366_v44 = vadd.f32 %v2365_v40, %v4588_v14  ;;  %v2559_v46 = vadd.f32 %v2558_v42, %v4590_v16  ;;  %v2367_v48 = vpop.f32.mrb[101].mxu1  ;;  %v2560_v49 = vpop.f32.mrb[69].mxu0 }
 0x4e0   : > { %v2368_v51 = vadd.f32 %v2367_v48, %v4594_v22  ;;  %v2561_v27 = vadd.f32 %v2560_v49, %v4596_v56  ;;  %v2369_v52 = vpop.f32.mrb[102].mxu1  ;;  %v2562_v33 = vpop.f32.mrb[70].mxu0 }
 0x4e1   : > { %2715 = vst [vmem:[%s4604_s14 + $0x40] sm:$0xff] %v2366_v44  ;;  %2717 = vst [vmem:[%s4604_s14 + $0x50] sm:$0xff] %v2559_v46  ;;  %v2370_v38 = vadd.f32 %v2369_v52, %v4588_v14  ;;  %v2563_v41 = vadd.f32 %v2562_v33, %v4590_v16  ;;  %v2371_v53 = vpop.f32.mrb[103].mxu1  ;;  %v2564_v54 = vpop.f32.mrb[71].mxu0 }
 0x4e2   : > { %2716 = vst [vmem:[%s4604_s14 + $0x48] sm:$0xff] %v2368_v51  ;;  %2718 = vst [vmem:[%s4604_s14 + $0x58] sm:$0xff] %v2561_v27  ;;  %v2372_v57 = vadd.f32 %v2371_v53, %v4594_v22  ;;  %v2565_v59 = vadd.f32 %v2564_v54, %v4596_v56 }
 0x4e3   : > { %2719 = vst [vmem:[%s4604_s14 + $0x60] sm:$0xff] %v2370_v38  ;;  %2721 = vst [vmem:[%s4604_s14 + $0x70] sm:$0xff] %v2563_v41 }
 0x4e4   : > { %2720 = vst [vmem:[%s4604_s14 + $0x68] sm:$0xff] %v2372_v57  ;;  %2722 = vst [vmem:[%s4604_s14 + $0x78] sm:$0xff] %v2565_v59 }
 0x4e6   : > { %v2375_v43 = vpop.f32.mrb[104].mxu1  ;;  %v2568_v47 = vpop.f32.mrb[72].mxu0 }
 0x4e7   : > { %v2376_v60 = vadd.f32 %v2375_v43, %v4588_v14  ;;  %v2569_v55 = vadd.f32 %v2568_v47, %v4590_v16  ;;  %v2377_v58 = vpop.f32.mrb[105].mxu1  ;;  %v2570_v61 = vpop.f32.mrb[73].mxu0 }
 0x4e8   : > { %v2378_v63 = vadd.f32 %v2377_v58, %v4594_v22  ;;  %v2571_v62 = vadd.f32 %v2570_v61, %v4596_v56  ;;  %v2379_v2 = vpop.f32.mrb[106].mxu1  ;;  %v2572_v10 = vpop.f32.mrb[74].mxu0 }
 0x4e9   : > { %2723 = vst [vmem:[%s4604_s14 + $0x80] sm:$0xff] %v2376_v60  ;;  %2725 = vst [vmem:[%s4604_s14 + $0x90] sm:$0xff] %v2569_v55  ;;  %v2380_v29 = vadd.f32 %v2379_v2, %v4588_v14  ;;  %v2573_v0 = vadd.f32 %v2572_v10, %v4590_v16  ;;  %v2381_v1 = vpop.f32.mrb[107].mxu1  ;;  %v2574_v3 = vpop.f32.mrb[75].mxu0 }
 0x4ea   : > { %2724 = vst [vmem:[%s4604_s14 + $0x88] sm:$0xff] %v2378_v63  ;;  %2726 = vst [vmem:[%s4604_s14 + $0x98] sm:$0xff] %v2571_v62  ;;  %v2382_v4 = vadd.f32 %v2381_v1, %v4594_v22  ;;  %v2575_v5 = vadd.f32 %v2574_v3, %v4596_v56 }
 0x4eb   : > { %2727 = vst [vmem:[%s4604_s14 + $0xa0] sm:$0xff] %v2380_v29  ;;  %2729 = vst [vmem:[%s4604_s14 + $0xb0] sm:$0xff] %v2573_v0 }
 0x4ec   : > { %2728 = vst [vmem:[%s4604_s14 + $0xa8] sm:$0xff] %v2382_v4  ;;  %2730 = vst [vmem:[%s4604_s14 + $0xb8] sm:$0xff] %v2575_v5 }
 0x4ee   : > { %v2385_v35 = vpop.f32.mrb[108].mxu1  ;;  %v2578_v31 = vpop.f32.mrb[76].mxu0 }
 0x4ef   : > { %v2386_v6 = vadd.f32 %v2385_v35, %v4588_v14  ;;  %v2579_v45 = vadd.f32 %v2578_v31, %v4590_v16  ;;  %v2387_v7 = vpop.f32.mrb[109].mxu1  ;;  %v2580_v50 = vpop.f32.mrb[77].mxu0 }
 0x4f0   : > { %v2388_v8 = vadd.f32 %v2387_v7, %v4594_v22  ;;  %v2581_v9 = vadd.f32 %v2580_v50, %v4596_v56  ;;  %v2389_v11 = vpop.f32.mrb[110].mxu1  ;;  %v2582_v20 = vpop.f32.mrb[78].mxu0 }
 0x4f1   : > { %2731 = vst [vmem:[%s4604_s14 + $0xc0] sm:$0xff] %v2386_v6  ;;  %2733 = vst [vmem:[%s4604_s14 + $0xd0] sm:$0xff] %v2579_v45  ;;  %v2390_v12 = vadd.f32 %v2389_v11, %v4588_v14  ;;  %v2583_v13 = vadd.f32 %v2582_v20, %v4590_v16  ;;  %v2391_v18 = vpop.f32.mrb[111].mxu1  ;;  %v2584_v23 = vpop.f32.mrb[79].mxu0 }
 0x4f2   : > { %2732 = vst [vmem:[%s4604_s14 + $0xc8] sm:$0xff] %v2388_v8  ;;  %2734 = vst [vmem:[%s4604_s14 + $0xd8] sm:$0xff] %v2581_v9  ;;  %v2392_v24 = vadd.f32 %v2391_v18, %v4594_v22  ;;  %v2585_v25 = vadd.f32 %v2584_v23, %v4596_v56 }
 0x4f3   : > { %2735 = vst [vmem:[%s4604_s14 + $0xe0] sm:$0xff] %v2390_v12  ;;  %2737 = vst [vmem:[%s4604_s14 + $0xf0] sm:$0xff] %v2583_v13 }
 0x4f4   : > { %2736 = vst [vmem:[%s4604_s14 + $0xe8] sm:$0xff] %v2392_v24  ;;  %2738 = vst [vmem:[%s4604_s14 + $0xf8] sm:$0xff] %v2585_v25 }
 0x4f6   : > { %v2395_v26 = vpop.f32.mrb[112].mxu1  ;;  %v2588_v28 = vpop.f32.mrb[80].mxu0 }
 0x4f7   : > { %v2396_v15 = vadd.f32 %v2395_v26, %v4588_v14  ;;  %v2589_v19 = vadd.f32 %v2588_v28, %v4590_v16  ;;  %v2397_v30 = vpop.f32.mrb[113].mxu1  ;;  %v2590_v32 = vpop.f32.mrb[81].mxu0 }
 0x4f8   : > { %v2398_v17 = vadd.f32 %v2397_v30, %v4594_v22  ;;  %v2591_v21 = vadd.f32 %v2590_v32, %v4596_v56  ;;  %v2399_v34 = vpop.f32.mrb[114].mxu1  ;;  %v2592_v36 = vpop.f32.mrb[82].mxu0 }
 0x4f9   : > { %2739 = vst [vmem:[%s4604_s14 + $0x100] sm:$0xff] %v2396_v15  ;;  %2741 = vst [vmem:[%s4604_s14 + $0x110] sm:$0xff] %v2589_v19  ;;  %v2400_v37 = vadd.f32 %v2399_v34, %v4588_v14  ;;  %v2593_v39 = vadd.f32 %v2592_v36, %v4590_v16  ;;  %v2401_v40 = vpop.f32.mrb[115].mxu1  ;;  %v2594_v42 = vpop.f32.mrb[83].mxu0 }
 0x4fa   : > { %2740 = vst [vmem:[%s4604_s14 + $0x108] sm:$0xff] %v2398_v17  ;;  %2742 = vst [vmem:[%s4604_s14 + $0x118] sm:$0xff] %v2591_v21  ;;  %v2402_v44 = vadd.f32 %v2401_v40, %v4594_v22  ;;  %v2595_v46 = vadd.f32 %v2594_v42, %v4596_v56 }
 0x4fb   : > { %2743 = vst [vmem:[%s4604_s14 + $0x120] sm:$0xff] %v2400_v37  ;;  %2745 = vst [vmem:[%s4604_s14 + $0x130] sm:$0xff] %v2593_v39 }
 0x4fc   : > { %2744 = vst [vmem:[%s4604_s14 + $0x128] sm:$0xff] %v2402_v44  ;;  %2746 = vst [vmem:[%s4604_s14 + $0x138] sm:$0xff] %v2595_v46 }
 0x4fe   : > { %v2405_v48 = vpop.f32.mrb[116].mxu1  ;;  %v2598_v49 = vpop.f32.mrb[84].mxu0 }
 0x4ff   : > { %v2406_v51 = vadd.f32 %v2405_v48, %v4588_v14  ;;  %v2599_v27 = vadd.f32 %v2598_v49, %v4590_v16  ;;  %v2407_v52 = vpop.f32.mrb[117].mxu1  ;;  %v2600_v33 = vpop.f32.mrb[85].mxu0 }
 0x500   : > { %v2408_v38 = vadd.f32 %v2407_v52, %v4594_v22  ;;  %v2601_v41 = vadd.f32 %v2600_v33, %v4596_v56  ;;  %v2409_v53 = vpop.f32.mrb[118].mxu1  ;;  %v2602_v54 = vpop.f32.mrb[86].mxu0 }
 0x501   : > { %2747 = vst [vmem:[%s4604_s14 + $0x140] sm:$0xff] %v2406_v51  ;;  %2749 = vst [vmem:[%s4604_s14 + $0x150] sm:$0xff] %v2599_v27  ;;  %v2410_v57 = vadd.f32 %v2409_v53, %v4588_v14  ;;  %v2603_v59 = vadd.f32 %v2602_v54, %v4590_v16  ;;  %v2411_v43 = vpop.f32.mrb[119].mxu1  ;;  %v2604_v47 = vpop.f32.mrb[87].mxu0 }
 0x502   : > { %2748 = vst [vmem:[%s4604_s14 + $0x148] sm:$0xff] %v2408_v38  ;;  %2750 = vst [vmem:[%s4604_s14 + $0x158] sm:$0xff] %v2601_v41  ;;  %v2412_v60 = vadd.f32 %v2411_v43, %v4594_v22  ;;  %v2605_v55 = vadd.f32 %v2604_v47, %v4596_v56 }
 0x503   : > { %2751 = vst [vmem:[%s4604_s14 + $0x160] sm:$0xff] %v2410_v57  ;;  %2753 = vst [vmem:[%s4604_s14 + $0x170] sm:$0xff] %v2603_v59 }
 0x504   : > { %2752 = vst [vmem:[%s4604_s14 + $0x168] sm:$0xff] %v2412_v60  ;;  %2754 = vst [vmem:[%s4604_s14 + $0x178] sm:$0xff] %v2605_v55 }
 0x506   : > { %v2415_v58 = vpop.f32.mrb[120].mxu1  ;;  %v2608_v61 = vpop.f32.mrb[88].mxu0 }
 0x507   : > { %v2416_v63 = vadd.f32 %v2415_v58, %v4588_v14  ;;  %v2609_v62 = vadd.f32 %v2608_v61, %v4590_v16  ;;  %v2417_v2 = vpop.f32.mrb[121].mxu1  ;;  %v2610_v10 = vpop.f32.mrb[89].mxu0 }
 0x508   : > { %v2418_v29 = vadd.f32 %v2417_v2, %v4594_v22  ;;  %v2611_v0 = vadd.f32 %v2610_v10, %v4596_v56  ;;  %v2419_v1 = vpop.f32.mrb[122].mxu1  ;;  %v2612_v3 = vpop.f32.mrb[90].mxu0 }
 0x509   : > { %2755 = vst [vmem:[%s4604_s14 + $0x180] sm:$0xff] %v2416_v63  ;;  %2757 = vst [vmem:[%s4604_s14 + $0x190] sm:$0xff] %v2609_v62  ;;  %v2420_v4 = vadd.f32 %v2419_v1, %v4588_v14  ;;  %v2613_v5 = vadd.f32 %v2612_v3, %v4590_v16  ;;  %v2421_v35 = vpop.f32.mrb[123].mxu1  ;;  %v2614_v31 = vpop.f32.mrb[91].mxu0 }
 0x50a   : > { %2756 = vst [vmem:[%s4604_s14 + $0x188] sm:$0xff] %v2418_v29  ;;  %2758 = vst [vmem:[%s4604_s14 + $0x198] sm:$0xff] %v2611_v0  ;;  %v2422_v6 = vadd.f32 %v2421_v35, %v4594_v22  ;;  %v2615_v45 = vadd.f32 %v2614_v31, %v4596_v56 }
 0x50b   : > { %2759 = vst [vmem:[%s4604_s14 + $0x1a0] sm:$0xff] %v2420_v4  ;;  %2761 = vst [vmem:[%s4604_s14 + $0x1b0] sm:$0xff] %v2613_v5 }
 0x50c   : > { %2760 = vst [vmem:[%s4604_s14 + $0x1a8] sm:$0xff] %v2422_v6  ;;  %2762 = vst [vmem:[%s4604_s14 + $0x1b8] sm:$0xff] %v2615_v45 }
 0x50e   : > { %v2425_v7 = vpop.f32.mrb[124].mxu1  ;;  %v2618_v50 = vpop.f32.mrb[92].mxu0 }
 0x50f   : > { %v2426_v8 = vadd.f32 %v2425_v7, %v4588_v14  ;;  %v2619_v9 = vadd.f32 %v2618_v50, %v4590_v16  ;;  %v2427_v11 = vpop.f32.mrb[125].mxu1  ;;  %v2620_v20 = vpop.f32.mrb[93].mxu0 }
 0x510   : > { %v2428_v12 = vadd.f32 %v2427_v11, %v4594_v22  ;;  %v2621_v13 = vadd.f32 %v2620_v20, %v4596_v56  ;;  %v2429_v18 = vpop.f32.mrb[126].mxu1  ;;  %v2622_v23 = vpop.f32.mrb[94].mxu0 }
 0x511   : > { %2763 = vst [vmem:[%s4604_s14 + $0x1c0] sm:$0xff] %v2426_v8  ;;  %2765 = vst [vmem:[%s4604_s14 + $0x1d0] sm:$0xff] %v2619_v9  ;;  %v2430_v24 = vadd.f32 %v2429_v18, %v4588_v14  ;;  %v2623_v25 = vadd.f32 %v2622_v23, %v4590_v16  ;;  %v2431_v26 = vpop.f32.mrb[127].mxu1  ;;  %v2624_v28 = vpop.f32.mrb[95].mxu0 }
 0x512   : > { %2764 = vst [vmem:[%s4604_s14 + $0x1c8] sm:$0xff] %v2428_v12  ;;  %2766 = vst [vmem:[%s4604_s14 + $0x1d8] sm:$0xff] %v2621_v13  ;;  %v2432_v15 = vadd.f32 %v2431_v26, %v4594_v22  ;;  %v2625_v19 = vadd.f32 %v2624_v28, %v4596_v56 }
 0x513   : > { %2767 = vst [vmem:[%s4604_s14 + $0x1e0] sm:$0xff] %v2430_v24  ;;  %2769 = vst [vmem:[%s4604_s14 + $0x1f0] sm:$0xff] %v2623_v25 }
 0x514   : > { %2768 = vst [vmem:[%s4604_s14 + $0x1e8] sm:$0xff] %v2432_v15  ;;  %2770 = vst [vmem:[%s4604_s14 + $0x1f8] sm:$0xff] %v2625_v19 }
 0x516   : > { %v2435_v30 = vpop.f32.mrb[128].mxu1  ;;  %v2628_v32 = vpop.f32.mrb[96].mxu0 }
 0x517   : > { %v2436_v17 = vadd.f32 %v2435_v30, %v4588_v14  ;;  %v2629_v21 = vadd.f32 %v2628_v32, %v4590_v16  ;;  %v2437_v34 = vpop.f32.mrb[129].mxu1  ;;  %v2630_v36 = vpop.f32.mrb[97].mxu0 }
 0x518   : > { %v2438_v37 = vadd.f32 %v2437_v34, %v4594_v22  ;;  %v2631_v39 = vadd.f32 %v2630_v36, %v4596_v56  ;;  %v2439_v40 = vpop.f32.mrb[130].mxu1  ;;  %v2632_v42 = vpop.f32.mrb[98].mxu0 }
 0x519   : > { %2771 = vst [vmem:[%s4604_s14 + $0x200] sm:$0xff] %v2436_v17  ;;  %2773 = vst [vmem:[%s4604_s14 + $0x210] sm:$0xff] %v2629_v21  ;;  %v2440_v44 = vadd.f32 %v2439_v40, %v4588_v14  ;;  %v2633_v46 = vadd.f32 %v2632_v42, %v4590_v16  ;;  %v2441_v48 = vpop.f32.mrb[131].mxu1  ;;  %v2634_v49 = vpop.f32.mrb[99].mxu0 }
 0x51a   : > { %2772 = vst [vmem:[%s4604_s14 + $0x208] sm:$0xff] %v2438_v37  ;;  %2774 = vst [vmem:[%s4604_s14 + $0x218] sm:$0xff] %v2631_v39  ;;  %v2442_v51 = vadd.f32 %v2441_v48, %v4594_v22  ;;  %v2635_v27 = vadd.f32 %v2634_v49, %v4596_v56 }
 0x51b   : > { %2775 = vst [vmem:[%s4604_s14 + $0x220] sm:$0xff] %v2440_v44  ;;  %2777 = vst [vmem:[%s4604_s14 + $0x230] sm:$0xff] %v2633_v46 }
 0x51c   : > { %2776 = vst [vmem:[%s4604_s14 + $0x228] sm:$0xff] %v2442_v51  ;;  %2778 = vst [vmem:[%s4604_s14 + $0x238] sm:$0xff] %v2635_v27 }
 0x51e   : > { %v2445_v52 = vpop.f32.mrb[132].mxu1  ;;  %v2638_v33 = vpop.f32.mrb[100].mxu0 }
 0x51f   : > { %v2446_v38 = vadd.f32 %v2445_v52, %v4588_v14  ;;  %v2639_v41 = vadd.f32 %v2638_v33, %v4590_v16  ;;  %v2447_v53 = vpop.f32.mrb[133].mxu1  ;;  %v2640_v54 = vpop.f32.mrb[101].mxu0 }
 0x520   : > { %v2448_v57 = vadd.f32 %v2447_v53, %v4594_v22  ;;  %v2641_v59 = vadd.f32 %v2640_v54, %v4596_v56  ;;  %v2449_v43 = vpop.f32.mrb[134].mxu1  ;;  %v2642_v47 = vpop.f32.mrb[102].mxu0 }
 0x521   : > { %2779 = vst [vmem:[%s4604_s14 + $0x240] sm:$0xff] %v2446_v38  ;;  %2781 = vst [vmem:[%s4604_s14 + $0x250] sm:$0xff] %v2639_v41  ;;  %v2450_v60 = vadd.f32 %v2449_v43, %v4588_v14  ;;  %v2643_v55 = vadd.f32 %v2642_v47, %v4590_v16  ;;  %v2451_v58 = vpop.f32.mrb[135].mxu1  ;;  %v2644_v61 = vpop.f32.mrb[103].mxu0 }
 0x522   : > { %2780 = vst [vmem:[%s4604_s14 + $0x248] sm:$0xff] %v2448_v57  ;;  %2782 = vst [vmem:[%s4604_s14 + $0x258] sm:$0xff] %v2641_v59  ;;  %v2452_v63 = vadd.f32 %v2451_v58, %v4594_v22  ;;  %v2645_v62 = vadd.f32 %v2644_v61, %v4596_v56 }
 0x523   : > { %2783 = vst [vmem:[%s4604_s14 + $0x260] sm:$0xff] %v2450_v60  ;;  %2785 = vst [vmem:[%s4604_s14 + $0x270] sm:$0xff] %v2643_v55 }
 0x524   : > { %2784 = vst [vmem:[%s4604_s14 + $0x268] sm:$0xff] %v2452_v63  ;;  %2786 = vst [vmem:[%s4604_s14 + $0x278] sm:$0xff] %v2645_v62 }
 0x526   : > { %v2455_v2 = vpop.f32.mrb[136].mxu1 }
 0x527   : > { %v2456_v10 = vadd.f32 %v2455_v2, %v4588_v14  ;;  %v2457_v29 = vpop.f32.mrb[137].mxu1 }
 0x528   : > { %v2458_v0 = vadd.f32 %v2457_v29, %v4594_v22  ;;  %v2459_v1 = vpop.f32.mrb[138].mxu1 }
 0x529   : > { %2787 = vst [vmem:[%s4604_s14 + $0x280] sm:$0xff] %v2456_v10  ;;  %v2460_v3 = vadd.f32 %v2459_v1, %v4588_v14  ;;  %v2461_v4 = vpop.f32.mrb[139].mxu1 }
 0x52a   : > { %2788 = vst [vmem:[%s4604_s14 + $0x288] sm:$0xff] %v2458_v0  ;;  %v2462_v5 = vadd.f32 %v2461_v4, %v4594_v22 }
 0x52b   : > { %2791 = vst [vmem:[%s4604_s14 + $0x2a0] sm:$0xff] %v2460_v3 }
 0x52c   : > { %2792 = vst [vmem:[%s4604_s14 + $0x2a8] sm:$0xff] %v2462_v5 }
 0x52e   : > { %v2465_v35 = vpop.f32.mrb[140].mxu1 }
 0x52f   : > { %v2466_v31 = vadd.f32 %v2465_v35, %v4588_v14  ;;  %v2467_v6 = vpop.f32.mrb[141].mxu1 }
 0x530   : > { %v2468_v45 = vadd.f32 %v2467_v6, %v4594_v22  ;;  %v2469_v7 = vpop.f32.mrb[142].mxu1 }
 0x531   : > { %2795 = vst [vmem:[%s4604_s14 + $0x2c0] sm:$0xff] %v2466_v31  ;;  %v2470_v50 = vadd.f32 %v2469_v7, %v4588_v14  ;;  %v2471_v8 = vpop.f32.mrb[143].mxu1 }
 0x532   : > { %2796 = vst [vmem:[%s4604_s14 + $0x2c8] sm:$0xff] %v2468_v45  ;;  %v2472_v9 = vadd.f32 %v2471_v8, %v4594_v22 }
 0x533   : > { %2799 = vst [vmem:[%s4604_s14 + $0x2e0] sm:$0xff] %v2470_v50 }
 0x534   : > { %2800 = vst [vmem:[%s4604_s14 + $0x2e8] sm:$0xff] %v2472_v9 }
 0x536   : > { %v2475_v11 = vpop.f32.mrb[144].mxu1 }
 0x537   : > { %v2476_v20 = vadd.f32 %v2475_v11, %v4588_v14  ;;  %v2477_v12 = vpop.f32.mrb[145].mxu1 }
 0x538   : > { %v2478_v13 = vadd.f32 %v2477_v12, %v4594_v22  ;;  %v2479_v18 = vpop.f32.mrb[146].mxu1 }
 0x539   : > { %2803 = vst [vmem:[%s4604_s14 + $0x300] sm:$0xff] %v2476_v20  ;;  %v2480_v23 = vadd.f32 %v2479_v18, %v4588_v14  ;;  %v2481_v24 = vpop.f32.mrb[147].mxu1 }
 0x53a   : > { %2804 = vst [vmem:[%s4604_s14 + $0x308] sm:$0xff] %v2478_v13  ;;  %v2482_v25 = vadd.f32 %v2481_v24, %v4594_v22 }
 0x53b   : > { %2807 = vst [vmem:[%s4604_s14 + $0x320] sm:$0xff] %v2480_v23 }
 0x53c   : > { %2808 = vst [vmem:[%s4604_s14 + $0x328] sm:$0xff] %v2482_v25 }
 0x53e   : > { %v2485_v26 = vpop.f32.mrb[148].mxu1 }
 0x53f   : > { %v2486_v28 = vadd.f32 %v2485_v26, %v4588_v14  ;;  %v2487_v15 = vpop.f32.mrb[149].mxu1 }
 0x540   : > { %v2488_v19 = vadd.f32 %v2487_v15, %v4594_v22  ;;  %v2489_v30 = vpop.f32.mrb[150].mxu1 }
 0x541   : > { %2811 = vst [vmem:[%s4604_s14 + $0x340] sm:$0xff] %v2486_v28  ;;  %v2490_v32 = vadd.f32 %v2489_v30, %v4588_v14  ;;  %v2491_v17 = vpop.f32.mrb[151].mxu1 }
 0x542   : > { %2812 = vst [vmem:[%s4604_s14 + $0x348] sm:$0xff] %v2488_v19  ;;  %v2492_v21 = vadd.f32 %v2491_v17, %v4594_v22 }
 0x543   : > { %2815 = vst [vmem:[%s4604_s14 + $0x360] sm:$0xff] %v2490_v32 }
 0x544   : > { %2816 = vst [vmem:[%s4604_s14 + $0x368] sm:$0xff] %v2492_v21 }
 0x546   : > { %v2495_v34 = vpop.f32.mrb[152].mxu1 }
 0x547   : > { %v2496_v36 = vadd.f32 %v2495_v34, %v4588_v14  ;;  %v2497_v37 = vpop.f32.mrb[153].mxu1 }
 0x548   : > { %v2498_v39 = vadd.f32 %v2497_v37, %v4594_v22  ;;  %v2499_v40 = vpop.f32.mrb[154].mxu1 }
 0x549   : > { %2819 = vst [vmem:[%s4604_s14 + $0x380] sm:$0xff] %v2496_v36  ;;  %v2500_v42 = vadd.f32 %v2499_v40, %v4588_v14  ;;  %v2501_v44 = vpop.f32.mrb[155].mxu1 }
 0x54a   : > { %2820 = vst [vmem:[%s4604_s14 + $0x388] sm:$0xff] %v2498_v39  ;;  %v2502_v46 = vadd.f32 %v2501_v44, %v4594_v22 }
 0x54b   : > { %2823 = vst [vmem:[%s4604_s14 + $0x3a0] sm:$0xff] %v2500_v42 }
 0x54c   : > { %2824 = vst [vmem:[%s4604_s14 + $0x3a8] sm:$0xff] %v2502_v46 }
 0x54e   : > { %v2505_v48 = vpop.f32.mrb[156].mxu1 }
 0x54f   : > { %v2506_v49 = vadd.f32 %v2505_v48, %v4588_v14  ;;  %v2507_v51 = vpop.f32.mrb[157].mxu1 }
 0x550   : > { %v2508_v27 = vadd.f32 %v2507_v51, %v4594_v22  ;;  %v2509_v52 = vpop.f32.mrb[158].mxu1 }
 0x551   : > { %2827 = vst [vmem:[%s4604_s14 + $0x3c0] sm:$0xff] %v2506_v49  ;;  %v2510_v33 = vadd.f32 %v2509_v52, %v4588_v14  ;;  %v2511_v38 = vpop.f32.mrb[159].mxu1 }
 0x552   : > { %2828 = vst [vmem:[%s4604_s14 + $0x3c8] sm:$0xff] %v2508_v27  ;;  %v2512_v41 = vadd.f32 %v2511_v38, %v4594_v22 }
 0x553   : > { %2831 = vst [vmem:[%s4604_s14 + $0x3e0] sm:$0xff] %v2510_v33 }
 0x554   : > { %2832 = vst [vmem:[%s4604_s14 + $0x3e8] sm:$0xff] %v2512_v41 }
 0x556   : > { %v2648_v53 = vpop.f32.mrb[160].mxu1 }
 0x557   : > { %v2649_v54 = vadd.f32 %v2648_v53, %v4590_v16  ;;  %v2650_v57 = vpop.f32.mrb[161].mxu1 }
 0x558   : > { %v2651_v59 = vadd.f32 %v2650_v57, %v4596_v56  ;;  %v2652_v43 = vpop.f32.mrb[162].mxu1 }
 0x559   : > { %2789 = vst [vmem:[%s4604_s14 + $0x290] sm:$0xff] %v2649_v54  ;;  %v2653_v14 = vadd.f32 %v2652_v43, %v4590_v16  ;;  %v2654_v47 = vpop.f32.mrb[163].mxu1 }
 0x55a   : > { %2790 = vst [vmem:[%s4604_s14 + $0x298] sm:$0xff] %v2651_v59  ;;  %v2655_v22 = vadd.f32 %v2654_v47, %v4596_v56 }
 0x55b   : > { %2793 = vst [vmem:[%s4604_s14 + $0x2b0] sm:$0xff] %v2653_v14 }
 0x55c   : > { %2794 = vst [vmem:[%s4604_s14 + $0x2b8] sm:$0xff] %v2655_v22 }
 0x55e   : > { %v2658_v60 = vpop.f32.mrb[164].mxu1 }
 0x55f   : > { %v2659_v55 = vadd.f32 %v2658_v60, %v4590_v16  ;;  %v2660_v58 = vpop.f32.mrb[165].mxu1 }
 0x560   : > { %v2661_v61 = vadd.f32 %v2660_v58, %v4596_v56  ;;  %v2662_v63 = vpop.f32.mrb[166].mxu1 }
 0x561   : > { %2797 = vst [vmem:[%s4604_s14 + $0x2d0] sm:$0xff] %v2659_v55  ;;  %v2663_v62 = vadd.f32 %v2662_v63, %v4590_v16  ;;  %v2664_v2 = vpop.f32.mrb[167].mxu1 }
 0x562   : > { %2798 = vst [vmem:[%s4604_s14 + $0x2d8] sm:$0xff] %v2661_v61  ;;  %v2665_v10 = vadd.f32 %v2664_v2, %v4596_v56 }
 0x563   : > { %2801 = vst [vmem:[%s4604_s14 + $0x2f0] sm:$0xff] %v2663_v62 }
 0x564   : > { %2802 = vst [vmem:[%s4604_s14 + $0x2f8] sm:$0xff] %v2665_v10 }
 0x566   : > { %v2668_v29 = vpop.f32.mrb[168].mxu1 }
 0x567   : > { %v2669_v0 = vadd.f32 %v2668_v29, %v4590_v16  ;;  %v2670_v1 = vpop.f32.mrb[169].mxu1 }
 0x568   : > { %v2671_v3 = vadd.f32 %v2670_v1, %v4596_v56  ;;  %v2672_v4 = vpop.f32.mrb[170].mxu1 }
 0x569   : > { %2805 = vst [vmem:[%s4604_s14 + $0x310] sm:$0xff] %v2669_v0  ;;  %v2673_v5 = vadd.f32 %v2672_v4, %v4590_v16  ;;  %v2674_v35 = vpop.f32.mrb[171].mxu1 }
 0x56a   : > { %2806 = vst [vmem:[%s4604_s14 + $0x318] sm:$0xff] %v2671_v3  ;;  %v2675_v31 = vadd.f32 %v2674_v35, %v4596_v56 }
 0x56b   : > { %2809 = vst [vmem:[%s4604_s14 + $0x330] sm:$0xff] %v2673_v5 }
 0x56c   : > { %2810 = vst [vmem:[%s4604_s14 + $0x338] sm:$0xff] %v2675_v31 }
 0x56e   : > { %v2678_v6 = vpop.f32.mrb[172].mxu1 }
 0x56f   : > { %v2679_v45 = vadd.f32 %v2678_v6, %v4590_v16  ;;  %v2680_v7 = vpop.f32.mrb[173].mxu1 }
 0x570   : > { %v2681_v50 = vadd.f32 %v2680_v7, %v4596_v56  ;;  %v2682_v8 = vpop.f32.mrb[174].mxu1 }
 0x571   : > { %2813 = vst [vmem:[%s4604_s14 + $0x350] sm:$0xff] %v2679_v45  ;;  %v2683_v9 = vadd.f32 %v2682_v8, %v4590_v16  ;;  %v2684_v11 = vpop.f32.mrb[175].mxu1 }
 0x572   : > { %2814 = vst [vmem:[%s4604_s14 + $0x358] sm:$0xff] %v2681_v50  ;;  %v2685_v20 = vadd.f32 %v2684_v11, %v4596_v56 }
 0x573   : > { %2817 = vst [vmem:[%s4604_s14 + $0x370] sm:$0xff] %v2683_v9 }
 0x574   : > { %2818 = vst [vmem:[%s4604_s14 + $0x378] sm:$0xff] %v2685_v20 }
 0x576   : > { %v2688_v12 = vpop.f32.mrb[176].mxu1 }
 0x577   : > { %v2689_v13 = vadd.f32 %v2688_v12, %v4590_v16  ;;  %v2690_v18 = vpop.f32.mrb[177].mxu1 }
 0x578   : > { %v2691_v23 = vadd.f32 %v2690_v18, %v4596_v56  ;;  %v2692_v24 = vpop.f32.mrb[178].mxu1 }
 0x579   : > { %2821 = vst [vmem:[%s4604_s14 + $0x390] sm:$0xff] %v2689_v13  ;;  %v2693_v25 = vadd.f32 %v2692_v24, %v4590_v16  ;;  %v2694_v26 = vpop.f32.mrb[179].mxu1 }
 0x57a   : > { %2822 = vst [vmem:[%s4604_s14 + $0x398] sm:$0xff] %v2691_v23  ;;  %v2695_v28 = vadd.f32 %v2694_v26, %v4596_v56 }
 0x57b   : > { %2825 = vst [vmem:[%s4604_s14 + $0x3b0] sm:$0xff] %v2693_v25 }
 0x57c   : > { %2826 = vst [vmem:[%s4604_s14 + $0x3b8] sm:$0xff] %v2695_v28 }
 0x57e   : > { %v2698_v15 = vpop.f32.mrb[180].mxu1 }
 0x57f   : > { %v2699_v19 = vadd.f32 %v2698_v15, %v4590_v16  ;;  %v2700_v30 = vpop.f32.mrb[181].mxu1 }
 0x580   : > { %v2701_v32 = vadd.f32 %v2700_v30, %v4596_v56  ;;  %v2702_v17 = vpop.f32.mrb[182].mxu1 }
 0x581   : > { %2829 = vst [vmem:[%s4604_s14 + $0x3d0] sm:$0xff] %v2699_v19  ;;  %v2703_v21 = vadd.f32 %v2702_v17, %v4590_v16  ;;  %v2704_v34 = vpop.f32.mrb[183].mxu1 }
 0x582   : > { %2830 = vst [vmem:[%s4604_s14 + $0x3d8] sm:$0xff] %v2701_v32  ;;  %v2705_v36 = vadd.f32 %v2704_v34, %v4596_v56 }
 0x583   : > { %2833 = vst [vmem:[%s4604_s14 + $0x3f0] sm:$0xff] %v2703_v21 }
 0x584   : > { %2834 = vst [vmem:[%s4604_s14 + $0x3f8] sm:$0xff] %v2705_v36 }
 0x585   : > { %3860 = shalt.err (!%p3857_p13)
}
 0x586   : > { %s3861_s28 = scalar_lea.hbm %s4859_s15, 16384  ;;  %s3865_s26 = scalar_lea.hbm %s4944_s9, 32768 }
 0x587   : > { %p3862_p0 = scmp.ne.s32.totalorder %s4859_s15, %s3861_s28  ;;  %p3866_p1 = scmp.lt.u32.totalorder %s4859_s15, %s4944_s9 }
 0x588   : > { %p3867_p2 = scmp.lt.u32.totalorder %s3865_s26, %s3861_s28  ;;  %p3869_p6 = scmp.lt.u32.totalorder %s3861_s28, %s4859_s15 }
 0x589   : > { %p3863_p5 = pnand %p3862_p0, %p4135_p8 }
 0x58a   : > { %p3868_p4 = por %p3867_p2, %p3866_p1 }
 0x58b   : > { %p3864_p11 = pneg %p3863_p5 }
 0x58c   : > { %p3870_p10 = por %p3869_p6, %p3868_p4 }
 0x58e   : > { %p3871_p12 = pnand %p3870_p10, %p3864_p11 }
 0x590   : > { %3874 = shalt.err (!%p3871_p12)
}
 0x591   : > { %s3938_s8 = smov 512   ;;  %s3939_s24 = smov 32  }
 0x592   : > { %3457 = dma.vmem_to_hbm [thread:$0]  (%p4135_p8), %s4861_s18, 16384, %s4859_s15, %s2836_s13, %s3938_s8, %s3938_s8, %s3939_s24  }
 0x593 PF: > { %s4945_s17 = sld [smem:[#allocation16_spill]]  ;;  %s4946_s29 = sld [smem:[#allocation17_spill]] }
 0x594   : > { %p4948_p7 = scmp.ge.s32.totalorder %s3921_s12, 2 }
 0x599   : > { %s2865_s27 = sand.u32 1, %s4945_s17   ;;  %p4947_p3 = scmp.ne.s32.totalorder %s4946_s29, 0 }
 0x59a   : > { %s2866_s30 = scalar_lea.sflag [#allocation4], %s2865_s27 }
 0x59b   : > { %p3477_p9 = pnand %p4948_p7, %p4947_p3 }
 0x59d   : > { %3904 = dma.done.wait (!%p3477_p9), %s2866_s30, 16384  }
 0x59e   : > { %3906 = vsyncadd (!%p3477_p9), %s2866_s30, 4294950912  ;;  %p24_p13 = scmp.ge.s32.totalorder %s4122_s22, 4   ;;  %s4949_s30 = smov %s3913_s10 }
 0x59f   : > { %s4950_s10 = smov %s3917_s11  ;;  %s4951_s11 = smov %s4131_s16 }
 0x5a0   : > { %s4952_s12 = smov %s4122_s22  ;;  %26 = sbr.rel (!%p24_p13) target bundleno = 10 (0xa), region = 117 }
 0x5a7   :  { %2871 = vsyncpa [#allocation3], 1 }
 0x5a8   :  { %2873 = vsyncpa [#allocation3 + $0x1], 1 }
 0x5a9   :  { %2874 = vsyncpa [#allocation6], 1 }
 0x5aa   :  { %2875 = vsyncpa [#allocation9], 1 }
 0x5ab   :  { %2876 = vsyncpa [#allocation4], 1 }
 0x5ac   :  { %2878 = vsyncpa [#allocation4 + $0x1], 1 }

</bundles_post_ra>
